<compile_context>
chip_gen: v5e
topology: v5e:2x2
jax: 0.10.0
libtpu: 0.0.40
codegen_flags: <defaults>
</compile_context>

<pallas_src>
import math

import jax
import jax.numpy as jnp
from jax import lax
from jax.experimental import pallas as pl
from jax.experimental.pallas import tpu as pltpu

Q_DIM = 128                                   # fixed by the module (nn.Linear(input_size, 128))
_INV_SQRT_QDIM = 1.0 / math.sqrt(float(Q_DIM))


# --------------------------------------------------------------------------- #
# Main kernel: lin / Q projections, online softmax over instances, P@H accum,  #
# deferred V projection at finalize.                                           #
# --------------------------------------------------------------------------- #
def _main_kernel(feats_ref, mask_ref, mfeat_ref, wl_ref, bl_ref, wq_ref, bq_ref,
                 wv_ref, bv_ref,
                 s_ref, b_ref, m_ref, l_ref,
                 qmax_scr, m_scr, l_scr, ph_scr):
    f32 = jnp.float32
    bf16 = jnp.bfloat16
    i = pl.program_id(0)

    wl = wl_ref[...]                                   # bf16 (D, D)
    wq = wq_ref[...]                                   # bf16 (D, 128)

    # ---- one-time init: accumulators + q_max from the critical instances ----
    @pl.when(i == 0)
    def _init():
        hm = jnp.maximum(
            jnp.dot(mfeat_ref[...], wl, preferred_element_type=f32) + bl_ref[...], 0.0)
        qmax_scr[...] = jnp.tanh(
            jnp.dot(hm.astype(bf16), wq, preferred_element_type=f32)
            + bq_ref[...]).astype(bf16)                # (C, 128)
        m_scr[...] = jnp.full(m_scr.shape, -1e30, m_scr.dtype)
        l_scr[...] = jnp.zeros(l_scr.shape, l_scr.dtype)
        ph_scr[...] = jnp.zeros(ph_scr.shape, ph_scr.dtype)

    # ---- per-tile: lin -> ReLU -> Q  (bf16 MXU, f32 accumulate) -------------
    x = feats_ref[...]                                                  # bf16 (TN, D)
    h = jnp.maximum(jnp.dot(x, wl, preferred_element_type=f32) + bl_ref[...], 0.0)
    hb = h.astype(bf16)
    # TODO(synk): nn.Dropout on the V path is identity here (eval / p=0.0);
    # training-mode dropout would need pltpu.prng_seed / prng_random_bits.
    q = jnp.tanh(jnp.dot(hb, wq, preferred_element_type=f32) + bq_ref[...])  # (TN, 128) f32

    # ---- attention logits, lane-dense (C, TN): q_max @ Q^T / sqrt(128) ------
    s = lax.dot_general(qmax_scr[...], q.astype(bf16),
                        (((1,), (1,)), ((), ())),
                        preferred_element_type=f32) * _INV_SQRT_QDIM     # (C, TN)
    s = s + mask_ref[...]                    # additive pad mask (0 / -1e30), (1, TN)
    s_ref[...] = s                           # masked raw scores out (lane-dense)

    # ---- online softmax over instances + P@H accumulation (f32) -------------
    m_prev = m_scr[...]                                                  # (C, 1)
    m_new = jnp.maximum(m_prev, jnp.max(s, axis=1, keepdims=True))
    alpha = jnp.exp(m_prev - m_new)                                      # (C, 1)
    p = jnp.exp(s - m_new)                                               # (C, TN)
    l_scr[...] = alpha * l_scr[...] + jnp.sum(p, axis=1, keepdims=True)
    ph_scr[...] = alpha * ph_scr[...] + jnp.dot(
        p.astype(bf16), hb, preferred_element_type=f32)                  # (C, D) f32
    m_scr[...] = m_new

    # ---- finalize: exact normalize, deferred V projection in f32 ------------
    @pl.when(i == pl.num_programs(0) - 1)
    def _fin():
        l = l_scr[...]                                                   # (C, 1)
        bh = ph_scr[...] / l                                             # exact divide, once per bag
        # B = (A^T H) @ Wv + bv   (sum of each A column is 1)
        b_ref[...] = jnp.dot(bh, wv_ref[...], preferred_element_type=f32) + bv_ref[...]
        m_ref[...] = m_scr[...]
        l_ref[...] = l


# --------------------------------------------------------------------------- #
# Per-chip VMEM budget and tile selection                                      #
# --------------------------------------------------------------------------- #
def _vmem_limit_bytes():
    try:
        cap = int(pltpu.get_tpu_info().vmem_capacity_bytes)
    except Exception:
        cap = 64 * 1024 * 1024                 # conservative (v7x per-TC physical VMEM)
    # Leave headroom for compiler-internal scratch / double buffers:
    #   128 MiB (v5e/v6e) -> 96 MiB,   64 MiB (v7x) -> 48 MiB.
    return cap - max(16 * 1024 * 1024, cap // 4)


def _choose_tile_n(n, d, vmem_budget_bytes):
    """256-aligned instance tiles (good for v6e/v7x 256x256 MXU, fine on v5e),
    capped by a rough VMEM budget, balanced to limit tail padding."""
    if n <= 256:
        return max(8, ((n + 7) // 8) * 8)      # single tile, sublane aligned
    # per-row streaming cost: feats (2x bf16 buffers) + h f32 + hb bf16 + q/tmp
    per_row = d * (2 * 2 + 4 + 2) + Q_DIM * 6
    cap_rows = max(256, ((vmem_budget_bytes // 3) // per_row) // 256 * 256)
    max_tile = min(1024, cap_rows)
    blocks = (n + 255) // 256                  # number of 256-row blocks needed
    num_tiles = -(-(blocks * 256) // max_tile)
    return 256 * (-(-blocks // num_tiles))     # balance blocks across tiles


# --------------------------------------------------------------------------- #
# Wrapper                                                                      #
# --------------------------------------------------------------------------- #
def bclassifier_forward(feats, c, params):
    n, d = feats.shape
    n_cls = c.shape[1]
    f32, bf16 = jnp.float32, jnp.bfloat16

    # Critical-instance selection: per-class argmax over instances + row gather
    # (equivalent to sort(descending)[0]; lin is row-wise so raw-feats gather +
    # in-kernel lin matches the reference's f[idx]).
    idx = jnp.argmax(c, axis=0)                                          # (C,)
    m_feats = jnp.take(feats, idx, axis=0).astype(bf16)                  # (C, D)

    vmem_limit = _vmem_limit_bytes()
    tile_n = _choose_tile_n(n, d, vmem_limit)
    num_tiles = int(pl.cdiv(n, tile_n))
    n_pad = num_tiles * tile_n

    feats_b = feats.astype(bf16)
    if n_pad != n:
        feats_b = jnp.pad(feats_b, ((0, n_pad - n), (0, 0)))
    # Additive padding mask: 0 for valid instances, -1e30 for padded rows.
    mask_add = jnp.where(jnp.arange(n_pad) < n, 0.0, -1e30).astype(f32)[None, :]

    wl = params["w_lin"].astype(bf16); bl = params["b_lin"].astype(f32)
    wq = params["w_q"].astype(bf16);   bq = params["b_q"].astype(f32)
    wv = params["w_v"].astype(f32);    bv = params["b_v"].astype(f32)   # f32: finalize-only

    rep2 = lambda i: (0, 0)

    flops = (2 * n_pad * d * (d + Q_DIM)             # lin + q per instance
             + 2 * n_cls * n_pad * (Q_DIM + d)       # scores + P@H
             + 2 * n_cls * d * (2 * d + Q_DIM))      # q_max path + deferred V
    bytes_accessed = (feats_b.size * 2 + mask_add.size * 4
                      + (d * d + d * Q_DIM) * 2 + d * d * 4
                      + (n_cls * n_pad + n_cls * d + 2 * d + Q_DIM) * 4)
    cost = pl.CostEstimate(flops=int(flops),
                           transcendentals=int(n_pad * (Q_DIM + n_cls) + n_cls * Q_DIM),
                           bytes_accessed=int(bytes_accessed))

    scores, b_out, m_out, l_out = pl.pallas_call(
        _main_kernel,
        grid=(num_tiles,),
        in_specs=[
            pl.BlockSpec((tile_n, d), lambda i: (i, 0)),       # feats tile
            pl.BlockSpec((1, tile_n), lambda i: (0, i)),       # additive pad mask
            pl.BlockSpec((n_cls, d), rep2),                    # critical rows
            pl.BlockSpec((d, d), rep2),                        # w_lin
            pl.BlockSpec((1, d), rep2),                        # b_lin
            pl.BlockSpec((d, Q_DIM), rep2),                    # w_q
            pl.BlockSpec((1, Q_DIM), rep2),                    # b_q
            pl.BlockSpec((d, d), rep2),                        # w_v  (finalize only)
            pl.BlockSpec((1, d), rep2),                        # b_v
        ],
        out_specs=(
            pl.BlockSpec((n_cls, tile_n), lambda i: (0, i)),   # raw scores (lane-dense)
            pl.BlockSpec((n_cls, d), rep2),                    # B
            pl.BlockSpec((n_cls, 1), rep2),                    # softmax max
            pl.BlockSpec((n_cls, 1), rep2),                    # softmax sum
        ),
        out_shape=(
            jax.ShapeDtypeStruct((n_cls, n_pad), f32),
            jax.ShapeDtypeStruct((n_cls, d), f32),
            jax.ShapeDtypeStruct((n_cls, 1), f32),
            jax.ShapeDtypeStruct((n_cls, 1), f32),
        ),
        scratch_shapes=[
            pltpu.VMEM((n_cls, Q_DIM), bf16),   # q_max
            pltpu.VMEM((n_cls, 1), f32),        # running max
            pltpu.VMEM((n_cls, 1), f32),        # running sum
            pltpu.VMEM((n_cls, d), f32),        # P@H accumulator
        ],
        compiler_params=pltpu.CompilerParams(
            dimension_semantics=("arbitrary",),
            vmem_limit_bytes=int(vmem_limit)),
        cost_estimate=cost,
    )(feats_b, mask_add, m_feats, wl, bl, wq, bq, wv, bv)

    # Attention normalization in the wrapper (exact division, once per bag);
    # XLA fuses the exp/scale into the transpose it already performs.
    A = (jnp.exp(scores - m_out) / l_out).T[:n]                          # (N, C)

    # fcc epilogue in the wrapper: Conv1d(C, C, kernel=D) over the (1, C, D) bag rep.
    C_out = (jnp.einsum("cd,cdo->o", b_out, params["w_fcc"].astype(f32))[None, :]
             + params["b_fcc"].astype(f32))                              # (1, C)
    return C_out, A, b_out


# --------------------------------------------------------------------------- #
# Plain-JAX reference (matches the PyTorch module semantics, f32)              #
# --------------------------------------------------------------------------- #
def reference_forward(feats, c, p):
    f = jnp.maximum(feats @ p["w_lin"] + p["b_lin"], 0.0)
    V = f @ p["w_v"] + p["b_v"]
    Q = jnp.tanh(f @ p["w_q"] + p["b_q"])
    idx = jnp.argmax(c, axis=0)                      # m_indices[0, :]
    m_feats = f[idx]
    q_max = jnp.tanh(m_feats @ p["w_q"] + p["b_q"])
    A = Q @ q_max.T / jnp.sqrt(jnp.float32(Q_DIM))
    A = jax.nn.softmax(A, axis=0)
    B = A.T @ V
    C_out = jnp.einsum("cd,cdo->o", B, p["w_fcc"])[None, :] + p["b_fcc"]
    return C_out, A, B


def make_params(key, input_size, output_class):
    ks = jax.random.split(key, 8)
    scale = 0.1
    d, c = input_size, output_class
    # torch Linear weight is (out, in); stored here as (in, out). Conv1d weight is
    # (C_out, C_in, D); stored as (C_in, D, C_out).
    return {
        "w_lin": scale * jax.random.normal(ks[0], (d, d), jnp.float32),
        "b_lin": scale * jax.random.normal(ks[1], (1, d), jnp.float32),
        "w_q":   scale * jax.random.normal(ks[2], (d, Q_DIM), jnp.float32),
        "b_q":   scale * jax.random.normal(ks[3], (1, Q_DIM), jnp.float32),
        "w_v":   scale * jax.random.normal(ks[4], (d, d), jnp.float32),
        "b_v":   scale * jax.random.normal(ks[5], (1, d), jnp.float32),
        "w_fcc": scale * jax.random.normal(ks[6], (c, d, c), jnp.float32),
        "b_fcc": scale * jax.random.normal(ks[7], (1, c), jnp.float32),
    }


if __name__ == "__main__":
    # N chosen so the grid has multiple steps and the padded/masked tail tile is
    # exercised (1500 -> two 768-row tiles, 36 padded rows).
    N, D, C = 1500, 128, 4          # instances, input_size, output_class
    key = jax.random.PRNGKey(0)
    k_feat, k_c, k_p = jax.random.split(key, 3)
    feats = jax.random.normal(k_feat, (N, D), jnp.float32)
    c = jax.random.normal(k_c, (N, C), jnp.float32)
    params = make_params(k_p, D, C)

    fwd = jax.jit(bclassifier_forward)
    C_out, A, B = jax.block_until_ready(fwd(feats, c, params))
    C_ref, A_ref, B_ref = reference_forward(feats, c, params)

    assert C_out.shape == (1, C) and A.shape == (N, C) and B.shape == (C, D)
    # bf16 MXU operands -> loose-but-meaningful tolerances vs the f32 reference.
    assert jnp.allclose(A, A_ref, atol=5e-3, rtol=5e-2), "A mismatch"
    assert jnp.allclose(B, B_ref, atol=2e-2, rtol=5e-2), "B mismatch"
    assert jnp.allclose(C_out, C_ref, atol=5e-2, rtol=5e-2), "C mismatch"
    print("KERNEL_OK")
</pallas_src>

<mosaic_0001>
module attributes {stable_mosaic.version = 11 : i64} {
  func.func @_main_kernel(%arg0: i32, %arg1: memref<768x128xbf16, #tpu.memory_space<vmem>>, %arg2: memref<1x768xf32, #tpu.memory_space<vmem>>, %arg3: memref<4x128xbf16, #tpu.memory_space<vmem>>, %arg4: memref<128x128xbf16, #tpu.memory_space<vmem>>, %arg5: memref<1x128xf32, #tpu.memory_space<vmem>>, %arg6: memref<128x128xbf16, #tpu.memory_space<vmem>>, %arg7: memref<1x128xf32, #tpu.memory_space<vmem>>, %arg8: memref<128x128xf32, #tpu.memory_space<vmem>>, %arg9: memref<1x128xf32, #tpu.memory_space<vmem>>, %arg10: memref<4x768xf32, #tpu.memory_space<vmem>>, %arg11: memref<4x128xf32, #tpu.memory_space<vmem>>, %arg12: memref<4x1xf32, #tpu.memory_space<vmem>>, %arg13: memref<4x1xf32, #tpu.memory_space<vmem>>, %arg14: memref<4x128xbf16, #tpu.memory_space<vmem>>, %arg15: memref<4x1xf32, #tpu.memory_space<vmem>>, %arg16: memref<4x1xf32, #tpu.memory_space<vmem>>, %arg17: memref<4x128xf32, #tpu.memory_space<vmem>>) attributes {dimension_semantics = [#tpu.dimension_semantics<arbitrary>], iteration_bounds = array<i64: 2>, scalar_prefetch = 0 : i64, scratch_operands = 4 : i64, tpu.core_type = #tpu.core_type<tc>, window_params = [{transform_indices = @transform_0, window_bounds = array<i64: 768, 128>}, {transform_indices = @transform_1, window_bounds = array<i64: 1, 768>}, {pipeline_mode = #tpu.pipeline_mode<synchronous>, transform_indices = @transform_2, window_bounds = array<i64: 4, 128>}, {pipeline_mode = #tpu.pipeline_mode<synchronous>, transform_indices = @transform_3, window_bounds = array<i64: 128, 128>}, {pipeline_mode = #tpu.pipeline_mode<synchronous>, transform_indices = @transform_4, window_bounds = array<i64: 1, 128>}, {pipeline_mode = #tpu.pipeline_mode<synchronous>, transform_indices = @transform_5, window_bounds = array<i64: 128, 128>}, {pipeline_mode = #tpu.pipeline_mode<synchronous>, transform_indices = @transform_6, window_bounds = array<i64: 1, 128>}, {pipeline_mode = #tpu.pipeline_mode<synchronous>, transform_indices = @transform_7, window_bounds = array<i64: 128, 128>}, {pipeline_mode = #tpu.pipeline_mode<synchronous>, transform_indices = @transform_8, window_bounds = array<i64: 1, 128>}, {transform_indices = @transform_9, window_bounds = array<i64: 4, 768>}, {pipeline_mode = #tpu.pipeline_mode<synchronous>, transform_indices = @transform_10, window_bounds = array<i64: 4, 128>}, {pipeline_mode = #tpu.pipeline_mode<synchronous>, transform_indices = @transform_11, window_bounds = array<i64: 4, 1>}, {pipeline_mode = #tpu.pipeline_mode<synchronous>, transform_indices = @transform_12, window_bounds = array<i64: 4, 1>}]} {
    %c0 = arith.constant 0 : index
    %c0_0 = arith.constant 0 : index
    %0 = vector.load %arg4[%c0, %c0_0] : memref<128x128xbf16, #tpu.memory_space<vmem>>, vector<128x128xbf16>
    %c0_1 = arith.constant 0 : index
    %c0_2 = arith.constant 0 : index
    %1 = vector.load %arg6[%c0_1, %c0_2] : memref<128x128xbf16, #tpu.memory_space<vmem>>, vector<128x128xbf16>
    %c0_i32 = arith.constant 0 : i32
    %2 = arith.cmpi eq, %arg0, %c0_i32 : i32
    %3 = arith.extui %2 : i1 to i32
    %c0_i32_3 = arith.constant 0 : i32
    %4 = arith.cmpi ne, %3, %c0_i32_3 : i32
    scf.if %4 {
      %c0_36 = arith.constant 0 : index
      %c0_37 = arith.constant 0 : index
      %53 = vector.load %arg3[%c0_36, %c0_37] : memref<4x128xbf16, #tpu.memory_space<vmem>>, vector<4x128xbf16>
      %cst_38 = arith.constant dense<0.000000e+00> : vector<4x128xf32>
      %54 = tpu.matmul %53, %0, %cst_38 {dimension_numbers = #tpu.dot_dimension_numbers<[1], [0], [0], [1], [0, 0, 1, 1], [], []>} : vector<4x128xbf16>, vector<128x128xbf16>, vector<4x128xf32> -> vector<4x128xf32>
      %c0_39 = arith.constant 0 : index
      %c0_40 = arith.constant 0 : index
      %55 = vector.load %arg5[%c0_39, %c0_40] : memref<1x128xf32, #tpu.memory_space<vmem>>, vector<1x128xf32>
      %56 = vector.broadcast %55 : vector<1x128xf32> to vector<4x128xf32>
      %57 = arith.addf %54, %56 : vector<4x128xf32>
      %cst_41 = arith.constant 0.000000e+00 : f32
      %58 = vector.broadcast %cst_41 : f32 to vector<4x128xf32>
      %59 = arith.maximumf %57, %58 : vector<4x128xf32>
      %60 = arith.truncf %59 : vector<4x128xf32> to vector<4x128xbf16>
      %cst_42 = arith.constant dense<0.000000e+00> : vector<4x128xf32>
      %61 = tpu.matmul %60, %1, %cst_42 {dimension_numbers = #tpu.dot_dimension_numbers<[1], [0], [0], [1], [0, 0, 1, 1], [], []>} : vector<4x128xbf16>, vector<128x128xbf16>, vector<4x128xf32> -> vector<4x128xf32>
      %c0_43 = arith.constant 0 : index
      %c0_44 = arith.constant 0 : index
      %62 = vector.load %arg7[%c0_43, %c0_44] : memref<1x128xf32, #tpu.memory_space<vmem>>, vector<1x128xf32>
      %63 = vector.broadcast %62 : vector<1x128xf32> to vector<4x128xf32>
      %64 = arith.addf %61, %63 : vector<4x128xf32>
      %65 = math.tanh %64 : vector<4x128xf32>
      %66 = arith.truncf %65 : vector<4x128xf32> to vector<4x128xbf16>
      %c0_45 = arith.constant 0 : index
      %c0_46 = arith.constant 0 : index
      %67 = vector.load %arg14[%c0_45, %c0_46] : memref<4x128xbf16, #tpu.memory_space<vmem>>, vector<4x128xbf16>
      tpu.vector_store %arg14[%c0_45, %c0_46], %66 {strides = array<i32>} : memref<4x128xbf16, #tpu.memory_space<vmem>>, vector<4x128xbf16>,
      %cst_47 = arith.constant -1.000000e+30 : f32
      %68 = vector.broadcast %cst_47 : f32 to vector<4x1xf32>
      %c0_48 = arith.constant 0 : index
      %c0_49 = arith.constant 0 : index
      %69 = vector.load %arg15[%c0_48, %c0_49] : memref<4x1xf32, #tpu.memory_space<vmem>>, vector<4x1xf32>
      tpu.vector_store %arg15[%c0_48, %c0_49], %68 {strides = array<i32>} : memref<4x1xf32, #tpu.memory_space<vmem>>, vector<4x1xf32>,
      %cst_50 = arith.constant 0.000000e+00 : f32
      %70 = vector.broadcast %cst_50 : f32 to vector<4x1xf32>
      %c0_51 = arith.constant 0 : index
      %c0_52 = arith.constant 0 : index
      %71 = vector.load %arg16[%c0_51, %c0_52] : memref<4x1xf32, #tpu.memory_space<vmem>>, vector<4x1xf32>
      tpu.vector_store %arg16[%c0_51, %c0_52], %70 {strides = array<i32>} : memref<4x1xf32, #tpu.memory_space<vmem>>, vector<4x1xf32>,
      %cst_53 = arith.constant 0.000000e+00 : f32
      %72 = vector.broadcast %cst_53 : f32 to vector<4x128xf32>
      %c0_54 = arith.constant 0 : index
      %c0_55 = arith.constant 0 : index
      %73 = vector.load %arg17[%c0_54, %c0_55] : memref<4x128xf32, #tpu.memory_space<vmem>>, vector<4x128xf32>
      tpu.vector_store %arg17[%c0_54, %c0_55], %72 {strides = array<i32>} : memref<4x128xf32, #tpu.memory_space<vmem>>, vector<4x128xf32>,
    } else {
    }
    %c0_4 = arith.constant 0 : index
    %c0_5 = arith.constant 0 : index
    %5 = vector.load %arg1[%c0_4, %c0_5] : memref<768x128xbf16, #tpu.memory_space<vmem>>, vector<768x128xbf16>
    %cst = arith.constant dense<0.000000e+00> : vector<768x128xf32>
    %6 = tpu.matmul %5, %0, %cst {dimension_numbers = #tpu.dot_dimension_numbers<[1], [0], [0], [1], [0, 0, 1, 1], [], []>} : vector<768x128xbf16>, vector<128x128xbf16>, vector<768x128xf32> -> vector<768x128xf32>
    %c0_6 = arith.constant 0 : index
    %c0_7 = arith.constant 0 : index
    %7 = vector.load %arg5[%c0_6, %c0_7] : memref<1x128xf32, #tpu.memory_space<vmem>>, vector<1x128xf32>
    %8 = vector.broadcast %7 : vector<1x128xf32> to vector<768x128xf32>
    %9 = arith.addf %6, %8 : vector<768x128xf32>
    %cst_8 = arith.constant 0.000000e+00 : f32
    %10 = vector.broadcast %cst_8 : f32 to vector<768x128xf32>
    %11 = arith.maximumf %9, %10 : vector<768x128xf32>
    %12 = arith.truncf %11 : vector<768x128xf32> to vector<768x128xbf16>
    %cst_9 = arith.constant dense<0.000000e+00> : vector<768x128xf32>
    %13 = tpu.matmul %12, %1, %cst_9 {dimension_numbers = #tpu.dot_dimension_numbers<[1], [0], [0], [1], [0, 0, 1, 1], [], []>} : vector<768x128xbf16>, vector<128x128xbf16>, vector<768x128xf32> -> vector<768x128xf32>
    %c0_10 = arith.constant 0 : index
    %c0_11 = arith.constant 0 : index
    %14 = vector.load %arg7[%c0_10, %c0_11] : memref<1x128xf32, #tpu.memory_space<vmem>>, vector<1x128xf32>
    %15 = vector.broadcast %14 : vector<1x128xf32> to vector<768x128xf32>
    %16 = arith.addf %13, %15 : vector<768x128xf32>
    %17 = math.tanh %16 : vector<768x128xf32>
    %c0_12 = arith.constant 0 : index
    %c0_13 = arith.constant 0 : index
    %18 = vector.load %arg14[%c0_12, %c0_13] : memref<4x128xbf16, #tpu.memory_space<vmem>>, vector<4x128xbf16>
    %19 = arith.truncf %17 : vector<768x128xf32> to vector<768x128xbf16>
    %cst_14 = arith.constant dense<0.000000e+00> : vector<4x768xf32>
    %20 = tpu.matmul %18, %19, %cst_14 {dimension_numbers = #tpu.dot_dimension_numbers<[1], [1], [0], [0], [0, 0, 1, 0], [], []>} : vector<4x128xbf16>, vector<768x128xbf16>, vector<4x768xf32> -> vector<4x768xf32>
    %cst_15 = arith.constant 0.0883883461 : f32
    %21 = vector.broadcast %cst_15 : f32 to vector<4x768xf32>
    %22 = arith.mulf %20, %21 : vector<4x768xf32>
    %c0_16 = arith.constant 0 : index
    %c0_17 = arith.constant 0 : index
    %23 = vector.load %arg2[%c0_16, %c0_17] : memref<1x768xf32, #tpu.memory_space<vmem>>, vector<1x768xf32>
    %24 = vector.broadcast %23 : vector<1x768xf32> to vector<4x768xf32>
    %25 = arith.addf %22, %24 : vector<4x768xf32>
    %c0_18 = arith.constant 0 : index
    %c0_19 = arith.constant 0 : index
    %26 = vector.load %arg10[%c0_18, %c0_19] : memref<4x768xf32, #tpu.memory_space<vmem>>, vector<4x768xf32>
    tpu.vector_store %arg10[%c0_18, %c0_19], %25 {strides = array<i32>} : memref<4x768xf32, #tpu.memory_space<vmem>>, vector<4x768xf32>,
    %c0_20 = arith.constant 0 : index
    %c0_21 = arith.constant 0 : index
    %27 = vector.load %arg15[%c0_20, %c0_21] : memref<4x1xf32, #tpu.memory_space<vmem>>, vector<4x1xf32>
    %cst_22 = arith.constant dense<0xFF800000> : vector<4xf32>
    %28 = vector.multi_reduction <maximumf>, %25, %cst_22 [1] : vector<4x768xf32> to vector<4xf32>
    %29 = vector.shape_cast %28 : vector<4xf32> to vector<4x1xf32>
    %30 = arith.maximumf %27, %29 : vector<4x1xf32>
    %31 = arith.subf %27, %30 : vector<4x1xf32>
    %32 = math.exp %31 : vector<4x1xf32>
    %33 = vector.broadcast %30 : vector<4x1xf32> to vector<4x768xf32>
    %34 = arith.subf %25, %33 : vector<4x768xf32>
    %35 = math.exp %34 : vector<4x768xf32>
    %c0_23 = arith.constant 0 : index
    %c0_24 = arith.constant 0 : index
    %36 = vector.load %arg16[%c0_23, %c0_24] : memref<4x1xf32, #tpu.memory_space<vmem>>, vector<4x1xf32>
    %37 = arith.mulf %32, %36 : vector<4x1xf32>
    %cst_25 = arith.constant dense<0.000000e+00> : vector<4xf32>
    %38 = vector.multi_reduction <add>, %35, %cst_25 [1] : vector<4x768xf32> to vector<4xf32>
    %39 = vector.shape_cast %38 : vector<4xf32> to vector<4x1xf32>
    %40 = arith.addf %37, %39 : vector<4x1xf32>
    %c0_26 = arith.constant 0 : index
    %c0_27 = arith.constant 0 : index
    %41 = vector.load %arg16[%c0_26, %c0_27] : memref<4x1xf32, #tpu.memory_space<vmem>>, vector<4x1xf32>
    tpu.vector_store %arg16[%c0_26, %c0_27], %40 {strides = array<i32>} : memref<4x1xf32, #tpu.memory_space<vmem>>, vector<4x1xf32>,
    %c0_28 = arith.constant 0 : index
    %c0_29 = arith.constant 0 : index
    %42 = vector.load %arg17[%c0_28, %c0_29] : memref<4x128xf32, #tpu.memory_space<vmem>>, vector<4x128xf32>
    %43 = vector.broadcast %32 : vector<4x1xf32> to vector<4x128xf32>
    %44 = arith.mulf %43, %42 : vector<4x128xf32>
    %45 = arith.truncf %35 : vector<4x768xf32> to vector<4x768xbf16>
    %cst_30 = arith.constant dense<0.000000e+00> : vector<4x128xf32>
    %46 = tpu.matmul %45, %12, %cst_30 {dimension_numbers = #tpu.dot_dimension_numbers<[1], [0], [0], [1], [0, 0, 1, 1], [], []>} : vector<4x768xbf16>, vector<768x128xbf16>, vector<4x128xf32> -> vector<4x128xf32>
    %47 = arith.addf %44, %46 : vector<4x128xf32>
    %c0_31 = arith.constant 0 : index
    %c0_32 = arith.constant 0 : index
    %48 = vector.load %arg17[%c0_31, %c0_32] : memref<4x128xf32, #tpu.memory_space<vmem>>, vector<4x128xf32>
    tpu.vector_store %arg17[%c0_31, %c0_32], %47 {strides = array<i32>} : memref<4x128xf32, #tpu.memory_space<vmem>>, vector<4x128xf32>,
    %c0_33 = arith.constant 0 : index
    %c0_34 = arith.constant 0 : index
    %49 = vector.load %arg15[%c0_33, %c0_34] : memref<4x1xf32, #tpu.memory_space<vmem>>, vector<4x1xf32>
    tpu.vector_store %arg15[%c0_33, %c0_34], %30 {strides = array<i32>} : memref<4x1xf32, #tpu.memory_space<vmem>>, vector<4x1xf32>,
    %c1_i32 = arith.constant 1 : i32
    %50 = arith.cmpi eq, %arg0, %c1_i32 : i32
    %51 = arith.extui %50 : i1 to i32
    %c0_i32_35 = arith.constant 0 : i32
    %52 = arith.cmpi ne, %51, %c0_i32_35 : i32
    scf.if %52 {
      %c0_36 = arith.constant 0 : index
      %c0_37 = arith.constant 0 : index
      %53 = vector.load %arg16[%c0_36, %c0_37] : memref<4x1xf32, #tpu.memory_space<vmem>>, vector<4x1xf32>
      %c0_38 = arith.constant 0 : index
      %c0_39 = arith.constant 0 : index
      %54 = vector.load %arg17[%c0_38, %c0_39] : memref<4x128xf32, #tpu.memory_space<vmem>>, vector<4x128xf32>
      %55 = vector.broadcast %53 : vector<4x1xf32> to vector<4x128xf32>
      %56 = arith.divf %54, %55 : vector<4x128xf32>
      %c0_40 = arith.constant 0 : index
      %c0_41 = arith.constant 0 : index
      %57 = vector.load %arg8[%c0_40, %c0_41] : memref<128x128xf32, #tpu.memory_space<vmem>>, vector<128x128xf32>
      %cst_42 = arith.constant dense<0.000000e+00> : vector<4x128xf32>
      %58 = tpu.matmul %56, %57, %cst_42 {dimension_numbers = #tpu.dot_dimension_numbers<[1], [0], [0], [1], [0, 0, 1, 1], [], []>} : vector<4x128xf32>, vector<128x128xf32>, vector<4x128xf32> -> vector<4x128xf32>
      %c0_43 = arith.constant 0 : index
      %c0_44 = arith.constant 0 : index
      %59 = vector.load %arg9[%c0_43, %c0_44] : memref<1x128xf32, #tpu.memory_space<vmem>>, vector<1x128xf32>
      %60 = vector.broadcast %59 : vector<1x128xf32> to vector<4x128xf32>
      %61 = arith.addf %58, %60 : vector<4x128xf32>
      %c0_45 = arith.constant 0 : index
      %c0_46 = arith.constant 0 : index
      %62 = vector.load %arg11[%c0_45, %c0_46] : memref<4x128xf32, #tpu.memory_space<vmem>>, vector<4x128xf32>
      tpu.vector_store %arg11[%c0_45, %c0_46], %61 {strides = array<i32>} : memref<4x128xf32, #tpu.memory_space<vmem>>, vector<4x128xf32>,
      %c0_47 = arith.constant 0 : index
      %c0_48 = arith.constant 0 : index
      %63 = vector.load %arg15[%c0_47, %c0_48] : memref<4x1xf32, #tpu.memory_space<vmem>>, vector<4x1xf32>
      %c0_49 = arith.constant 0 : index
      %c0_50 = arith.constant 0 : index
      %64 = vector.load %arg12[%c0_49, %c0_50] : memref<4x1xf32, #tpu.memory_space<vmem>>, vector<4x1xf32>
      tpu.vector_store %arg12[%c0_49, %c0_50], %63 {strides = array<i32>} : memref<4x1xf32, #tpu.memory_space<vmem>>, vector<4x1xf32>,
      %c0_51 = arith.constant 0 : index
      %c0_52 = arith.constant 0 : index
      %65 = vector.load %arg13[%c0_51, %c0_52] : memref<4x1xf32, #tpu.memory_space<vmem>>, vector<4x1xf32>
      tpu.vector_store %arg13[%c0_51, %c0_52], %53 {strides = array<i32>} : memref<4x1xf32, #tpu.memory_space<vmem>>, vector<4x1xf32>,
    } else {
    }
    return
  }
  func.func @transform_0(%arg0: i32) -> (i32, i32) {
    %c0_i32 = arith.constant 0 : i32
    %c0_i32_0 = arith.constant 0 : i32
    return %arg0, %c0_i32 : i32, i32
  }
  func.func @transform_1(%arg0: i32) -> (i32, i32) {
    %c0_i32 = arith.constant 0 : i32
    %c0_i32_0 = arith.constant 0 : i32
    return %c0_i32, %arg0 : i32, i32
  }
  func.func @transform_2(%arg0: i32) -> (i32, i32) {
    %c0_i32 = arith.constant 0 : i32
    %c0_i32_0 = arith.constant 0 : i32
    %c0_i32_1 = arith.constant 0 : i32
    return %c0_i32, %c0_i32_0 : i32, i32
  }
  func.func @transform_3(%arg0: i32) -> (i32, i32) {
    %c0_i32 = arith.constant 0 : i32
    %c0_i32_0 = arith.constant 0 : i32
    %c0_i32_1 = arith.constant 0 : i32
    return %c0_i32, %c0_i32_0 : i32, i32
  }
  func.func @transform_4(%arg0: i32) -> (i32, i32) {
    %c0_i32 = arith.constant 0 : i32
    %c0_i32_0 = arith.constant 0 : i32
    %c0_i32_1 = arith.constant 0 : i32
    return %c0_i32, %c0_i32_0 : i32, i32
  }
  func.func @transform_5(%arg0: i32) -> (i32, i32) {
    %c0_i32 = arith.constant 0 : i32
    %c0_i32_0 = arith.constant 0 : i32
    %c0_i32_1 = arith.constant 0 : i32
    return %c0_i32, %c0_i32_0 : i32, i32
  }
  func.func @transform_6(%arg0: i32) -> (i32, i32) {
    %c0_i32 = arith.constant 0 : i32
    %c0_i32_0 = arith.constant 0 : i32
    %c0_i32_1 = arith.constant 0 : i32
    return %c0_i32, %c0_i32_0 : i32, i32
  }
  func.func @transform_7(%arg0: i32) -> (i32, i32) {
    %c0_i32 = arith.constant 0 : i32
    %c0_i32_0 = arith.constant 0 : i32
    %c0_i32_1 = arith.constant 0 : i32
    return %c0_i32, %c0_i32_0 : i32, i32
  }
  func.func @transform_8(%arg0: i32) -> (i32, i32) {
    %c0_i32 = arith.constant 0 : i32
    %c0_i32_0 = arith.constant 0 : i32
    %c0_i32_1 = arith.constant 0 : i32
    return %c0_i32, %c0_i32_0 : i32, i32
  }
  func.func @transform_9(%arg0: i32) -> (i32, i32) {
    %c0_i32 = arith.constant 0 : i32
    %c0_i32_0 = arith.constant 0 : i32
    return %c0_i32, %arg0 : i32, i32
  }
  func.func @transform_10(%arg0: i32) -> (i32, i32) {
    %c0_i32 = arith.constant 0 : i32
    %c0_i32_0 = arith.constant 0 : i32
    %c0_i32_1 = arith.constant 0 : i32
    return %c0_i32, %c0_i32_0 : i32, i32
  }
  func.func @transform_11(%arg0: i32) -> (i32, i32) {
    %c0_i32 = arith.constant 0 : i32
    %c0_i32_0 = arith.constant 0 : i32
    %c0_i32_1 = arith.constant 0 : i32
    return %c0_i32, %c0_i32_0 : i32, i32
  }
  func.func @transform_12(%arg0: i32) -> (i32, i32) {
    %c0_i32 = arith.constant 0 : i32
    %c0_i32_0 = arith.constant 0 : i32
    %c0_i32_1 = arith.constant 0 : i32
    return %c0_i32, %c0_i32_0 : i32, i32
  }
}

</mosaic_0001>

<bundles_post_ra>
// kernel: bclassifier_forward.1
= control target key start
LH: loop header
LB: loop body
LE: loop exit
PB: predicated region body
PF: predicated region fallthrough
CT: control target
= control target key end

     0   :  { %s3044_s21 = smov 0   ;;  %s4245_s0 = inlined_call_operand.vmem [shape: bf16[1536,128], index: 0, kind: input, shape index: {}]   ;;  %s4246_s1 = inlined_call_operand.vmem [shape: f32[1,1536], index: 1, kind: input, shape index: {}]   ;;  %s4247_s2 = inlined_call_operand.vmem [shape: bf16[4,128], index: 2, kind: input, shape index: {}]   ;;  %s4248_s3 = inlined_call_operand.vmem [shape: bf16[128,128], index: 3, kind: input, shape index: {}]   ;;  %s4249_s4 = inlined_call_operand.vmem [shape: f32[1,128], index: 4, kind: input, shape index: {}]   ;;  %s4250_s5 = inlined_call_operand.vmem [shape: bf16[128,128], index: 5, kind: input, shape index: {}]   ;;  %s4251_s6 = inlined_call_operand.vmem [shape: f32[1,128], index: 6, kind: input, shape index: {}]   ;;  %s4252_s7 = inlined_call_operand.vmem [shape: f32[128,128], index: 7, kind: input, shape index: {}]   ;;  %s4253_s8 = inlined_call_operand.vmem [shape: f32[1,128], index: 8, kind: input, shape index: {}]   ;;  %s4254_s9 = inlined_call_operand.vmem [shape: f32[4,1536], index: 9, kind: output, shape index: {0}]   ;;  %s4255_s10 = inlined_call_operand.vmem [shape: f32[4,128], index: 10, kind: output, shape index: {1}]   ;;  %s4256_s11 = inlined_call_operand.vmem [shape: f32[4,1], index: 11, kind: output, shape index: {2}]   ;;  %s4257_s12 = inlined_call_operand.vmem [shape: f32[4,1], index: 12, kind: output, shape index: {3}]  }
   0x1 LB: > { %s3050_s22 = sadd.s32 4294967295, %s2973_s21   ;;  %p2312_p0 = scmp.ge.s32.totalorder %s2973_s21, 1  ;;  %s2973_s21 = sphi %s3044_s21, %s23_s21  }
   0x2   : > { %p365_p1 = scmp.lt.s32.totalorder %s2973_s21, 3 }
   0x4   : > { %p366_p2 = pnand %p2312_p0, %p365_p1 }
   0x6   : > { %369 = sbr.rel (%p366_p2) target bundleno = 2111 (0x83f), region = 56 }
   0xb   : > { %s411_s23 = smul.u32 96, %s3050_s22  ;;  %v3058_v0 = vld [vmem:[%s4248_s3] sm:$0xf]  ;;  %v3069_v2 = vld [vmem:[%s4248_s3] sm:$0xf0]  ;;  %p2315_p5 = scmp.ne.s32.totalorder %s3050_s22, 0 }
   0xc   : > { %v3063_v1 = vld [vmem:[%s4248_s3] sm:$0xf]  ;;  %s417_s28 = smul.u32 6, %s3050_s22  ;;  %v3074_v3 = vld [vmem:[%s4248_s3] sm:$0xf0] }
   0xd   : > { %p412_p3 = scmp.lt.s32.totalorder %s411_s23, 191  ;;  %v3079_v4 = vld [vmem:[%s4248_s3 + $0x8] sm:$0xf]  ;;  %v3089_v6 = vld [vmem:[%s4248_s3 + $0x8] sm:$0xf0] }
   0xe   : > { %v3084_v5 = vld [vmem:[%s4248_s3 + $0x8] sm:$0xf]  ;;  %p418_p4 = scmp.lt.s32.totalorder %s417_s28, 11  ;;  %v3094_v7 = vld [vmem:[%s4248_s3 + $0x8] sm:$0xf0] }
   0xf   : > { %s4379_s23 = smov (!%p412_p3, %s411_s23), 191  ;;  %v3099_v8 = vld [vmem:[%s4248_s3 + $0x10] sm:$0xf]  ;;  %v3111_v10 = vld [vmem:[%s4248_s3 + $0x10] sm:$0xf0] }
  0x10   : > { %v3104_v9 = vld [vmem:[%s4248_s3 + $0x10] sm:$0xf]  ;;  %s4381_s28 = smov (!%p418_p4, %s417_s28), 11  ;;  %v3116_v11 = vld [vmem:[%s4248_s3 + $0x10] sm:$0xf0]  ;;  %s2313_s17 = sshll.u32 %s4379_s23, 2 }
  0x11   : > { %v3121_v12 = vld [vmem:[%s4248_s3 + $0x18] sm:$0xf]  ;;  %s3131_s27 = scalar_lea.vmem %s4245_s0, %s2313_s17  ;;  %s420_s13 = scalar_lea.vmem %s4246_s1, %s4381_s28  ;;  %v3140_v14 = vld [vmem:[%s4248_s3 + $0x18] sm:$0xf0]  ;;  %v3150_v16 = vld [vmem:[%s4248_s3 + $0x20] sm:$0xf] }
  0x12   : > { %v3126_v13 = vld [vmem:[%s4248_s3 + $0x18] sm:$0xf]  ;;  %v3145_v15 = vld [vmem:[%s4248_s3 + $0x18] sm:$0xf0]  ;;  %s2314_s17 = sshll.u32 %s4381_s28, 2 }
  0x13   : > { %v3156_v17 = vld [vmem:[%s4248_s3 + $0x20] sm:$0xf]  ;;  %v3161_v18 = vld [vmem:[%s4248_s3 + $0x20] sm:$0xf0]  ;;  %s3166_s23 = scalar_lea.vmem %s4254_s9, %s2314_s17  ;;  %v3174_v20 = vld [vmem:[%s4248_s3 + $0x28] sm:$0xf] }
  0x14   : > { %v2648_v19 = vld [vmem:[%s4248_s3 + $0x20] sm:$0xf0]  ;;  %v2338_v21 = vld [vmem:[%s4248_s3 + $0x28] sm:$0xf]  ;;  %v3182_v22 = vld [vmem:[%s4248_s3 + $0x28] sm:$0xf0] }
  0x15   : > { %v2650_v23 = vld [vmem:[%s4248_s3 + $0x28] sm:$0xf0]  ;;  %v3190_v24 = vld [vmem:[%s4248_s3 + $0x30] sm:$0xf]  ;;  %v3198_v26 = vld [vmem:[%s4248_s3 + $0x30] sm:$0xf0] }
  0x16   : > { %v2342_v25 = vld [vmem:[%s4248_s3 + $0x30] sm:$0xf]  ;;  %v2652_v27 = vld [vmem:[%s4248_s3 + $0x30] sm:$0xf0]  ;;  %v3206_v28 = vld [vmem:[%s4248_s3 + $0x38] sm:$0xf] }
  0x17   : > { %v2346_v29 = vld [vmem:[%s4248_s3 + $0x38] sm:$0xf]  ;;  %v3214_v30 = vld [vmem:[%s4248_s3 + $0x38] sm:$0xf0]  ;;  %v3222_v32 = vld [vmem:[%s4250_s5] sm:$0xf] }
  0x18   : > { %v2654_v31 = vld [vmem:[%s4248_s3 + $0x38] sm:$0xf0]  ;;  %4286 = vst [vmem:[#allocation6_spill] sm:$0xff] %v3222_v32  ;;  %v3227_v33 = vld [vmem:[%s4250_s5] sm:$0xf] }
  0x19   : > { %v3232_v34 = vld [vmem:[%s4250_s5] sm:$0xf0]  ;;  %v3242_v36 = vld [vmem:[%s4250_s5 + $0x8] sm:$0xf]  ;;  %v3250_v38 = vld [vmem:[%s4250_s5 + $0x8] sm:$0xf0] }
  0x1a   : > { %4287 = vst [vmem:[#allocation7_spill] sm:$0xff] %v3232_v34  ;;  %v3237_v35 = vld [vmem:[%s4250_s5] sm:$0xf0]  ;;  %v2354_v37 = vld [vmem:[%s4250_s5 + $0x8] sm:$0xf] }
  0x1b   : > { %4288 = vst [vmem:[#allocation8_spill] sm:$0xff] %v3242_v36  ;;  %v2658_v39 = vld [vmem:[%s4250_s5 + $0x8] sm:$0xf0]  ;;  %v3258_v40 = vld [vmem:[%s4250_s5 + $0x10] sm:$0xf] }
  0x1c   : > { %4289 = vst [vmem:[#allocation9_spill] sm:$0xff] %v3250_v38  ;;  %v2358_v41 = vld [vmem:[%s4250_s5 + $0x10] sm:$0xf]  ;;  %v3266_v42 = vld [vmem:[%s4250_s5 + $0x10] sm:$0xf0] }
  0x1d   : > { %4290 = vst [vmem:[#allocation10_spill] sm:$0xff] %v3258_v40  ;;  %v2660_v43 = vld [vmem:[%s4250_s5 + $0x10] sm:$0xf0]  ;;  %v3274_v44 = vld [vmem:[%s4250_s5 + $0x18] sm:$0xf] }
  0x1e   : > { %4291 = vst [vmem:[#allocation11_spill] sm:$0xff] %v3266_v42  ;;  %v2362_v45 = vld [vmem:[%s4250_s5 + $0x18] sm:$0xf]  ;;  %v3282_v46 = vld [vmem:[%s4250_s5 + $0x18] sm:$0xf0] }
  0x1f   : > { %4292 = vst [vmem:[#allocation12_spill] sm:$0xff] %v3274_v44  ;;  %v2662_v47 = vld [vmem:[%s4250_s5 + $0x18] sm:$0xf0]  ;;  %v3290_v48 = vld [vmem:[%s4250_s5 + $0x20] sm:$0xf] }
  0x20   : > { %4293 = vst [vmem:[#allocation13_spill] sm:$0xff] %v3282_v46  ;;  %v2366_v49 = vld [vmem:[%s4250_s5 + $0x20] sm:$0xf]  ;;  %v3298_v50 = vld [vmem:[%s4250_s5 + $0x20] sm:$0xf0] }
  0x21   : > { %4294 = vst [vmem:[#allocation14_spill] sm:$0xff] %v3298_v50  ;;  %v2664_v51 = vld [vmem:[%s4250_s5 + $0x20] sm:$0xf0]  ;;  %v3306_v52 = vld [vmem:[%s4250_s5 + $0x28] sm:$0xf]  ;;  %463 = sbr.rel (%p2315_p5) target bundleno = 341 (0x155), region = 60 }
  0x22   : > { %v2370_v53 = vld [vmem:[%s4250_s5 + $0x28] sm:$0xf]  ;;  %v3314_v54 = vld [vmem:[%s4250_s5 + $0x28] sm:$0xf0]  ;;  %v3322_v56 = vld [vmem:[%s4250_s5 + $0x30] sm:$0xf] }
  0x23   : > { %v2666_v55 = vld [vmem:[%s4250_s5 + $0x28] sm:$0xf0]  ;;  %v2374_v57 = vld [vmem:[%s4250_s5 + $0x30] sm:$0xf]  ;;  %v3330_v58 = vld [vmem:[%s4250_s5 + $0x30] sm:$0xf0] }
  0x24   : > { %v2668_v59 = vld [vmem:[%s4250_s5 + $0x30] sm:$0xf0]  ;;  %v3338_v60 = vld [vmem:[%s4250_s5 + $0x38] sm:$0xf]  ;;  %v3346_v62 = vld [vmem:[%s4250_s5 + $0x38] sm:$0xf0] }
  0x25   : > { %v2378_v61 = vld [vmem:[%s4250_s5 + $0x38] sm:$0xf]  ;;  %v2670_v63 = vld [vmem:[%s4250_s5 + $0x38] sm:$0xf0] }
  0x26   : > { %v2347_v34 = vor.u32 %v2654_v31, %v2346_v29  ;;  %v2343_v32 = vor.u32 %v2652_v27, %v2342_v25  ;;  %v2379_v38 = vor.u32 %v2670_v63, %v2378_v61  ;;  %v2375_v36 = vor.u32 %v2668_v59, %v2374_v57 }
  0x27   : > { %v2339_v42 = vor.u32 %v2650_v23, %v2338_v21  ;;  %v2371_v40 = vor.u32 %v2666_v55, %v2370_v53  ;;  %v2335_v46 = vor.u32 %v2648_v19, %v3156_v17  ;;  %v2367_v44 = vor.u32 %v2664_v51, %v2366_v49 }
  0x28   : > { %517 = vmatpush.bf16.msra.mxu0 %v2347_v34  ;;  %584 = vmatpush.bf16.msra.mxu1 %v2379_v38  ;;  %v2331_v50 = vor.u32 %v3145_v15, %v3126_v13  ;;  %v2363_v29 = vor.u32 %v2662_v47, %v2362_v45  ;;  %v2327_v25 = vor.u32 %v3116_v11, %v3104_v9  ;;  %v464_v13 = vld [vmem:[%s4247_s2] sm:$0x3]  ;;  %vm600_vm0 = vcmask 3072  }
  0x29   : > { %v2359_v27 = vor.u32 %v2660_v43, %v2358_v41  ;;  %v2323_v21 = vor.u32 %v3094_v7, %v3084_v5  ;;  %v2319_v17 = vor.u32 %v3074_v3, %v3063_v1  ;;  %v2355_v15 = vor.u32 %v2658_v39, %v2354_v37  ;;  %v2747_v5 = vld [vmem:[%s4249_s4] ss:$0 sm:$0xff] }
  0x2a   : > { %v2351_v9 = vor.u32 %v3237_v35, %v3227_v33  ;;  %v2975_v23 = vmov -1e+30   ;;  %v2976_v31 = vmov 0.0  }
  0x2b   : > { %601 = vst.msk [vmem:[#allocation3] sm:$0xf] %vm600_vm0, %v2975_v23 }
  0x2c   : > { %518 = vmatpush.bf16.msra.mxu0 %v2343_v32  ;;  %585 = vmatpush.bf16.msra.mxu1 %v2375_v36  ;;  %602 = vst.msk [vmem:[#allocation4] sm:$0xf] %vm600_vm0, %v2976_v31  ;;  %v2748_v32 = vld [vmem:[%s4251_s6] ss:$0 sm:$0xff] }
  0x2d   : > { %603 = vst [vmem:[#allocation5] sm:$0xf] %v2976_v31 }
  0x30   : > { %519 = vmatpush.bf16.msra.mxu0 %v2339_v42  ;;  %586 = vmatpush.bf16.msra.mxu1 %v2371_v40 }
  0x34   : > { %520 = vmatpush.bf16.msra.mxu0 %v2335_v46  ;;  %587 = vmatpush.bf16.msra.mxu1 %v2367_v44 }
  0x38   : > { %521 = vmatpush.bf16.msra.mxu0 %v2331_v50  ;;  %588 = vmatpush.bf16.msra.mxu1 %v2363_v29 }
  0x3c   : > { %522 = vmatpush.bf16.msra.mxu0 %v2327_v25  ;;  %589 = vmatpush.bf16.msra.mxu1 %v2359_v27 }
  0x40   : > { %523 = vmatpush.bf16.msra.mxu0 %v2323_v21  ;;  %590 = vmatpush.bf16.msra.mxu1 %v2355_v15 }
  0x44   : > { %524 = vmatpush.bf16.msra.mxu0 %v2319_v17  ;;  %591 = vmatpush.bf16.msra.mxu1 %v2351_v9 }
  0x47   : > { %525 = vmatmul.bf16.vlgmr.msra.gmra.mxu0 %v464_v13 }
  0xc4   : > { %v526_v7 = vpop.f32.mrf.mxu0 }
  0xc5   : > { %v527_v11 = vadd.f32 %v2747_v5, %v526_v7 }
  0xc7   : > { %v530_v19 = vmax.f32 %v527_v11, 0.0 }
  0xc9   : > { %v531_v1 = vpack.c.bf16 %v530_v19, %v530_v19 }
  0xcb   : > { %592 = vmatmul.bf16.vlgmr.msra.gmra.mxu1 %v531_v1 }
  0xcc   : > { %v528_v3 = vpop.f32.mrf.mxu0 }
 0x148   : > { %v593_v33 = vpop.f32.mrf.mxu1 }
 0x149   : > { %v594_v34 = vadd.f32 %v2748_v32, %v593_v33 }
 0x14b   : > { %2749 = vtanh.f32 %v594_v34 }
 0x150   : > { %v595_v35 = vpop.f32.mrf.mxu1 }
 0x151   : > { %v2750_v36 = vpop.eup %2749 }
 0x152   : > { %v598_v37 = vpack.c.bf16 %v2750_v36, %v2750_v36 }
 0x154   : > { %599 = vst [vmem:[#allocation2] sm:$0x3] %v598_v37 }
 0x155 PF: > { %v2603_v38 = vor.u32 %v3214_v30, %v3206_v28  ;;  %v2599_v39 = vor.u32 %v3198_v26, %v3190_v24  ;;  %v2595_v40 = vor.u32 %v3182_v22, %v3174_v20  ;;  %v2591_v41 = vor.u32 %v3161_v18, %v3150_v16  ;;  %v2675_v18 = vld [vmem:[%s3131_s27 + $0x20] sm:$0xff]  ;;  %v2677_v44 = vld [vmem:[%s3131_s27 + $0x30] sm:$0xff]  ;;  %v2680_v29 = vld [vmem:[%s3131_s27 + $0x48] sm:$0xff]  ;;  %p2636_p6 = scmp.ne.s32.totalorder %s3050_s22, 1 }
 0x156   : > { %v2587_v28 = vor.u32 %v3140_v14, %v3121_v12  ;;  %v2583_v24 = vor.u32 %v3111_v10, %v3099_v8  ;;  %v2579_v20 = vor.u32 %v3089_v6, %v3079_v4  ;;  %v2575_v16 = vor.u32 %v3069_v2, %v3058_v0  ;;  %v2671_v12 = vld [vmem:[%s3131_s27] sm:$0xff]  ;;  %v2672_v14 = vld [vmem:[%s3131_s27 + $0x8] sm:$0xff]  ;;  %v2673_v8 = vld [vmem:[%s3131_s27 + $0x10] sm:$0xff] }
 0x157   : > { %1040 = vmatpush.bf16.msra.mxu0 %v2603_v38  ;;  %2719 = vmatpush.bf16.msra.mxu2 %v2603_v38  ;;  %v2674_v10 = vld [vmem:[%s3131_s27 + $0x18] sm:$0xff]  ;;  %v2635_v4 = vor.u32 %v3346_v62, %v3338_v60  ;;  %v2676_v0 = vld [vmem:[%s3131_s27 + $0x28] sm:$0xff]  ;;  %v2631_v2 = vor.u32 %v3330_v58, %v3322_v56  ;;  %v2627_v6 = vor.u32 %v3314_v54, %v3306_v52  ;;  %v2679_v55 = vld [vmem:[%s3131_s27 + $0x40] sm:$0xff]  ;;  %vm1992_vm1 = vcmask 1043456  }
 0x158   : > { %v4295_v22 = vld [vmem:[#allocation14_spill] sm:$0xff]  ;;  %v4296_v30 = vld [vmem:[#allocation12_spill] sm:$0xff]  ;;  %v4297_v42 = vld [vmem:[#allocation13_spill] sm:$0xff]  ;;  %vm2059_vm2 = vcmask 3072  }
 0x159   : > { %1485 = vmatpush.bf16.msra.mxu1 %v2635_v4  ;;  %2727 = vmatpush.bf16.msra.mxu3 %v2635_v4  ;;  %v2623_v26 = vor.u32 %v4295_v22, %v3290_v48  ;;  %v2619_v43 = vor.u32 %v4297_v42, %v4296_v30  ;;  %v4298_v45 = vld [vmem:[#allocation10_spill] sm:$0xff]  ;;  %v4299_v46 = vld [vmem:[#allocation11_spill] sm:$0xff]  ;;  %v4300_v49 = vld [vmem:[#allocation8_spill] sm:$0xff] }
 0x15a   : > { %v2615_v47 = vor.u32 %v4299_v46, %v4298_v45  ;;  %v4301_v50 = vld [vmem:[#allocation9_spill] sm:$0xff]  ;;  %v4302_v51 = vld [vmem:[#allocation6_spill] sm:$0xff]  ;;  %v4303_v52 = vld [vmem:[#allocation7_spill] sm:$0xff] }
 0x15b   : > { %1041 = vmatpush.bf16.msra.mxu0 %v2599_v39  ;;  %2720 = vmatpush.bf16.msra.mxu2 %v2599_v39  ;;  %v2611_v48 = vor.u32 %v4301_v50, %v4300_v49  ;;  %v2607_v53 = vor.u32 %v4303_v52, %v4302_v51  ;;  %v2678_v54 = vld [vmem:[%s3131_s27 + $0x38] sm:$0xff]  ;;  %v3416_v57 = vld [vmem:[%s4249_s4] ss:$0 sm:$0xff]  ;;  %v2681_v5 = vld [vmem:[%s3131_s27 + $0x50] sm:$0xff] }
 0x15c   : > { %v2682_v32 = vld [vmem:[%s3131_s27 + $0x58] sm:$0xff] }
 0x15d   : > { %1486 = vmatpush.bf16.msra.mxu1 %v2631_v2  ;;  %2728 = vmatpush.bf16.msra.mxu3 %v2631_v2  ;;  %v2686_v49 = vld [vmem:[%s3131_s27 + $0x78] sm:$0xff] }
 0x15f   : > { %1042 = vmatpush.bf16.msra.mxu0 %v2595_v40  ;;  %2721 = vmatpush.bf16.msra.mxu2 %v2595_v40  ;;  %v2683_v40 = vld [vmem:[%s3131_s27 + $0x60] sm:$0xff] }
 0x161   : > { %1487 = vmatpush.bf16.msra.mxu1 %v2627_v6  ;;  %2729 = vmatpush.bf16.msra.mxu3 %v2627_v6 }
 0x163   : > { %1043 = vmatpush.bf16.msra.mxu0 %v2591_v41  ;;  %2722 = vmatpush.bf16.msra.mxu2 %v2591_v41 }
 0x165   : > { %1488 = vmatpush.bf16.msra.mxu1 %v2623_v26  ;;  %2730 = vmatpush.bf16.msra.mxu3 %v2623_v26  ;;  %v2685_v26 = vld [vmem:[%s3131_s27 + $0x70] sm:$0xff] }
 0x167   : > { %1044 = vmatpush.bf16.msra.mxu0 %v2587_v28  ;;  %2723 = vmatpush.bf16.msra.mxu2 %v2587_v28 }
 0x169   : > { %1489 = vmatpush.bf16.msra.mxu1 %v2619_v43  ;;  %2731 = vmatpush.bf16.msra.mxu3 %v2619_v43 }
 0x16b   : > { %1045 = vmatpush.bf16.msra.mxu0 %v2583_v24  ;;  %2724 = vmatpush.bf16.msra.mxu2 %v2583_v24 }
 0x16d   : > { %1490 = vmatpush.bf16.msra.mxu1 %v2615_v47  ;;  %2732 = vmatpush.bf16.msra.mxu3 %v2615_v47 }
 0x16f   : > { %1046 = vmatpush.bf16.msra.mxu0 %v2579_v20  ;;  %2725 = vmatpush.bf16.msra.mxu2 %v2579_v20 }
 0x171   : > { %1491 = vmatpush.bf16.msra.mxu1 %v2611_v48  ;;  %2733 = vmatpush.bf16.msra.mxu3 %v2611_v48 }
 0x173   : > { %1047 = vmatpush.bf16.msra.mxu0 %v2575_v16  ;;  %2726 = vmatpush.bf16.msra.mxu2 %v2575_v16 }
 0x175   : > { %1492 = vmatpush.bf16.msra.mxu1 %v2607_v53  ;;  %2734 = vmatpush.bf16.msra.mxu3 %v2607_v53 }
 0x176   : > { %1048 = vmatmul.bf16.vlgmr.msra.gmra.mxu0 %v2671_v12 }
 0x186   : > { %1053 = vmatmul.bf16.gmra.mxu0 %v2672_v14 }
 0x196   : > { %1058 = vmatmul.bf16.gmra.mxu0 %v2673_v8  ;;  %v2684_v8 = vld [vmem:[%s3131_s27 + $0x68] sm:$0xff] }
 0x1a6   : > { %1063 = vmatmul.bf16.gmra.mxu0 %v2674_v10 }
 0x1b6   : > { %1068 = vmatmul.bf16.gmra.mxu0 %v2675_v18 }
 0x1c6   : > { %1073 = vmatmul.bf16.gmra.mxu0 %v2676_v0 }
 0x1d6   : > { %1078 = vmatmul.bf16.gmra.mxu0 %v2677_v44 }
 0x1e6   : > { %1083 = vmatmul.bf16.gmra.mxu0 %v2678_v54 }
 0x1f3   : > { %v1049_v56 = vpop.f32.mrf.mxu0 }
 0x1f4   : > { %v1050_v58 = vadd.f32 %v3416_v57, %v1049_v56  ;;  %v2703_v56 = vld [vmem:[%s3131_s27 + $0x100] sm:$0xff] }
 0x1f5   : > { %1208 = vmatmul.bf16.vlgmr.msra.gmra.mxu2 %v2703_v56 }
 0x1f6   : > { %1088 = vmatmul.bf16.gmra.mxu0 %v2679_v55  ;;  %v1289_v61 = vmax.f32 %v1050_v58, 0.0  ;;  %v2687_v58 = vld [vmem:[%s3131_s27 + $0x80] sm:$0xff] }
 0x1fb   : > { %v1051_v59 = vpop.f32.mrf.mxu0 }
 0x1fc   : > { %v1052_v60 = vadd.f32 %v3416_v57, %v1051_v59 }
 0x1fe   : > { %v1290_v62 = vmax.f32 %v1052_v60, 0.0 }
 0x200   : > { %v3420_v63 = vpack.c.bf16 %v1290_v62, %v1289_v61 }
 0x202   : > { %1493 = vmatmul.bf16.vlgmr.msra.gmra.mxu1 %v3420_v63 }
 0x203   : > { %v1054_v25 = vpop.f32.mrf.mxu0 }
 0x204   : > { %v1055_v27 = vadd.f32 %v3416_v57, %v1054_v25 }
 0x206   : > { %1093 = vmatmul.bf16.gmra.mxu0 %v2680_v29  ;;  %v1291_v13 = vmax.f32 %v1055_v27, 0.0 }
 0x20b   : > { %v1056_v21 = vpop.f32.mrf.mxu0 }
 0x20c   : > { %v1057_v17 = vadd.f32 %v3416_v57, %v1056_v21 }
 0x20e   : > { %v1292_v15 = vmax.f32 %v1057_v17, 0.0  ;;  %v3474_v17 = vld [vmem:[%s4251_s6] ss:$0 sm:$0xff] }
 0x210   : > { %v3426_v9 = vpack.c.bf16 %v1292_v15, %v1291_v13  ;;  %v2704_v13 = vld [vmem:[%s3131_s27 + $0x108] sm:$0xff] }
 0x211   : > { %v2688_v15 = vld [vmem:[%s3131_s27 + $0x88] sm:$0xff]  ;;  %1213 = vmatmul.bf16.gmra.mxu2 %v2704_v13 }
 0x212   : > { %1498 = vmatmul.bf16.gmra.mxu1 %v3426_v9 }
 0x213   : > { %v1059_v7 = vpop.f32.mrf.mxu0 }
 0x214   : > { %v1060_v11 = vadd.f32 %v3416_v57, %v1059_v7 }
 0x216   : > { %1098 = vmatmul.bf16.gmra.mxu0 %v2681_v5  ;;  %v1293_v3 = vmax.f32 %v1060_v11, 0.0 }
 0x21b   : > { %v1061_v19 = vpop.f32.mrf.mxu0 }
 0x21c   : > { %v1062_v1 = vadd.f32 %v3416_v57, %v1061_v19 }
 0x21e   : > { %v1294_v23 = vmax.f32 %v1062_v1, 0.0 }
 0x220   : > { %v3432_v31 = vpack.c.bf16 %v1294_v23, %v1293_v3 }
 0x222   : > { %1503 = vmatmul.bf16.gmra.mxu1 %v3432_v31 }
 0x223   : > { %v1064_v33 = vpop.f32.mrf.mxu0 }
 0x224   : > { %v1065_v34 = vadd.f32 %v3416_v57, %v1064_v33 }
 0x226   : > { %1103 = vmatmul.bf16.gmra.mxu0 %v2682_v32  ;;  %v1295_v37 = vmax.f32 %v1065_v34, 0.0 }
 0x22b   : > { %v1066_v35 = vpop.f32.mrf.mxu0 }
 0x22c   : > { %v1067_v36 = vadd.f32 %v3416_v57, %v1066_v35 }
 0x22e   : > { %v1296_v38 = vmax.f32 %v1067_v36, 0.0 }
 0x230   : > { %v3438_v39 = vpack.c.bf16 %v1296_v38, %v1295_v37  ;;  %v2705_v38 = vld [vmem:[%s3131_s27 + $0x110] sm:$0xff] }
 0x231   : > { %1218 = vmatmul.bf16.gmra.mxu2 %v2705_v38  ;;  %v2692_v38 = vld [vmem:[%s3131_s27 + $0xa8] sm:$0xff] }
 0x232   : > { %1508 = vmatmul.bf16.gmra.mxu1 %v3438_v39 }
 0x233   : > { %v1069_v41 = vpop.f32.mrf.mxu0 }
 0x234   : > { %v1070_v28 = vadd.f32 %v3416_v57, %v1069_v41  ;;  %v2689_v41 = vld [vmem:[%s3131_s27 + $0x90] sm:$0xff] }
 0x236   : > { %1108 = vmatmul.bf16.gmra.mxu0 %v2683_v40  ;;  %v1297_v16 = vmax.f32 %v1070_v28, 0.0 }
 0x23b   : > { %v1071_v24 = vpop.f32.mrf.mxu0 }
 0x23c   : > { %v1072_v20 = vadd.f32 %v3416_v57, %v1071_v24 }
 0x23e   : > { %v1298_v12 = vmax.f32 %v1072_v20, 0.0 }
 0x240   : > { %v3444_v14 = vpack.c.bf16 %v1298_v12, %v1297_v16 }
 0x242   : > { %1513 = vmatmul.bf16.gmra.mxu1 %v3444_v14 }
 0x243   : > { %v1074_v10 = vpop.f32.mrf.mxu0 }
 0x244   : > { %v1075_v18 = vadd.f32 %v3416_v57, %v1074_v10 }
 0x246   : > { %1113 = vmatmul.bf16.gmra.mxu0 %v2684_v8  ;;  %v1299_v2 = vmax.f32 %v1075_v18, 0.0 }
 0x24b   : > { %v1076_v4 = vpop.f32.mrf.mxu0 }
 0x24c   : > { %v1077_v0 = vadd.f32 %v3416_v57, %v1076_v4 }
 0x24e   : > { %v1300_v6 = vmax.f32 %v1077_v0, 0.0 }
 0x250   : > { %v3450_v22 = vpack.c.bf16 %v1300_v6, %v1299_v2 }
 0x252   : > { %1518 = vmatmul.bf16.gmra.mxu1 %v3450_v22 }
 0x253   : > { %v1079_v30 = vpop.f32.mrf.mxu0 }
 0x254   : > { %v1080_v42 = vadd.f32 %v3416_v57, %v1079_v30  ;;  %v2706_v30 = vld [vmem:[%s3131_s27 + $0x118] sm:$0xff] }
 0x255   : > { %1223 = vmatmul.bf16.gmra.mxu2 %v2706_v30 }
 0x256   : > { %1118 = vmatmul.bf16.gmra.mxu0 %v2685_v26  ;;  %v1301_v45 = vmax.f32 %v1080_v42, 0.0 }
 0x25b   : > { %v1081_v43 = vpop.f32.mrf.mxu0 }
 0x25c   : > { %v1082_v44 = vadd.f32 %v3416_v57, %v1081_v43  ;;  %v2690_v43 = vld [vmem:[%s3131_s27 + $0x98] sm:$0xff] }
 0x25e   : > { %v1302_v46 = vmax.f32 %v1082_v44, 0.0 }
 0x260   : > { %v3456_v47 = vpack.c.bf16 %v1302_v46, %v1301_v45 }
 0x262   : > { %1523 = vmatmul.bf16.gmra.mxu1 %v3456_v47 }
 0x263   : > { %v1084_v50 = vpop.f32.mrf.mxu0 }
 0x264   : > { %v1085_v48 = vadd.f32 %v3416_v57, %v1084_v50 }
 0x266   : > { %1123 = vmatmul.bf16.gmra.mxu0 %v2686_v49  ;;  %v1303_v53 = vmax.f32 %v1085_v48, 0.0 }
 0x26b   : > { %v1086_v51 = vpop.f32.mrf.mxu0 }
 0x26c   : > { %v1087_v52 = vadd.f32 %v3416_v57, %v1086_v51 }
 0x26e   : > { %v1304_v54 = vmax.f32 %v1087_v52, 0.0 }
 0x270   : > { %v3462_v55 = vpack.c.bf16 %v1304_v54, %v1303_v53 }
 0x272   : > { %1528 = vmatmul.bf16.gmra.mxu1 %v3462_v55 }
 0x273   : > { %v1089_v59 = vpop.f32.mrf.mxu0 }
 0x274   : > { %v1090_v60 = vadd.f32 %v3416_v57, %v1089_v59 }
 0x276   : > { %1128 = vmatmul.bf16.gmra.mxu0 %v2687_v58  ;;  %v1305_v29 = vmax.f32 %v1090_v60, 0.0  ;;  %v2707_v60 = vld [vmem:[%s3131_s27 + $0x120] sm:$0xff] }
 0x277   : > { %1228 = vmatmul.bf16.gmra.mxu2 %v2707_v60 }
 0x27b   : > { %v1091_v61 = vpop.f32.mrf.mxu0 }
 0x27c   : > { %v1092_v62 = vadd.f32 %v3416_v57, %v1091_v61 }
 0x27e   : > { %v1306_v25 = vmax.f32 %v1092_v62, 0.0  ;;  %v2691_v62 = vld [vmem:[%s3131_s27 + $0xa0] sm:$0xff] }
 0x27f   : > { %v1494_v27 = vpop.f32.mrf.mxu1 }
 0x280   : > { %v3469_v21 = vpack.c.bf16 %v1306_v25, %v1305_v29  ;;  %v1495_v7 = vadd.f32 %v3474_v17, %v1494_v27 }
 0x282   : > { %4304 = vst [vmem:[#allocation14_spill] sm:$0xff] %v3469_v21  ;;  %1533 = vmatmul.bf16.gmra.mxu1 %v3469_v21  ;;  %2755 = vtanh.f32 %v1495_v7 }
 0x283   : > { %v1094_v5 = vpop.f32.mrf.mxu0 }
 0x284   : > { %v1095_v1 = vadd.f32 %v3416_v57, %v1094_v5 }
 0x286   : > { %1133 = vmatmul.bf16.gmra.mxu0 %v2688_v15  ;;  %v1307_v32 = vmax.f32 %v1095_v1, 0.0 }
 0x287   : > { %v1496_v11 = vpop.f32.mrf.mxu1 }
 0x288   : > { %v1497_v19 = vadd.f32 %v3474_v17, %v1496_v11  ;;  %v3483_v34 = vpop.eup %2755 }
 0x28a   : > { %2757 = vtanh.f32 %v1497_v19 }
 0x28b   : > { %v1096_v3 = vpop.f32.mrf.mxu0 }
 0x28c   : > { %v1097_v23 = vadd.f32 %v3416_v57, %v1096_v3 }
 0x28e   : > { %v1308_v33 = vmax.f32 %v1097_v23, 0.0 }
 0x28f   : > { %v1499_v35 = vpop.f32.mrf.mxu1 }
 0x290   : > { %v3485_v36 = vpop.eup %2757  ;;  %v3487_v37 = vpack.c.bf16 %v1308_v33, %v1307_v32  ;;  %v1500_v24 = vadd.f32 %v3474_v17, %v1499_v35  ;;  %v2708_v33 = vld [vmem:[%s3131_s27 + $0x128] sm:$0xff] }
 0x291   : > { %v1831_v40 = vpack.c.bf16 %v3485_v36, %v3483_v34  ;;  %1233 = vmatmul.bf16.gmra.mxu2 %v2708_v33  ;;  %v2716_v36 = vld [vmem:[%s3131_s27 + $0x168] sm:$0xff] }
 0x292   : > { %4305 = vst [vmem:[#allocation12_spill] sm:$0xff] %v3487_v37  ;;  %1538 = vmatmul.bf16.gmra.mxu1 %v3487_v37  ;;  %2759 = vtanh.f32 %v1500_v24 }
 0x293   : > { %v1099_v28 = vpop.f32.mrf.mxu0 }
 0x294   : > { %v1100_v12 = vadd.f32 %v3416_v57, %v1099_v28 }
 0x296   : > { %1138 = vmatmul.bf16.gmra.mxu0 %v2689_v41  ;;  %v1309_v18 = vmax.f32 %v1100_v12, 0.0 }
 0x297   : > { %v1501_v20 = vpop.f32.mrf.mxu1 }
 0x298   : > { %v1502_v16 = vadd.f32 %v3474_v17, %v1501_v20  ;;  %v3498_v0 = vpop.eup %2759 }
 0x29a   : > { %2761 = vtanh.f32 %v1502_v16 }
 0x29b   : > { %v1101_v8 = vpop.f32.mrf.mxu0 }
 0x29c   : > { %v1102_v10 = vadd.f32 %v3416_v57, %v1101_v8 }
 0x29e   : > { %v1310_v4 = vmax.f32 %v1102_v10, 0.0 }
 0x29f   : > { %v1504_v2 = vpop.f32.mrf.mxu1 }
 0x2a0   : > { %v3500_v6 = vpop.eup %2761  ;;  %v3502_v26 = vpack.c.bf16 %v1310_v4, %v1309_v18  ;;  %v1505_v45 = vadd.f32 %v3474_v17, %v1504_v2 }
 0x2a1   : > { %v1832_v42 = vpack.c.bf16 %v3500_v6, %v3498_v0 }
 0x2a2   : > { %4306 = vst [vmem:[#allocation13_spill] sm:$0xff] %v3502_v26  ;;  %1543 = vmatmul.bf16.gmra.mxu1 %v3502_v26  ;;  %2763 = vtanh.f32 %v1505_v45 }
 0x2a3   : > { %v1104_v44 = vpop.f32.mrf.mxu0 }
 0x2a4   : > { %v1105_v50 = vadd.f32 %v3416_v57, %v1104_v44  ;;  %v2709_v44 = vld [vmem:[%s3131_s27 + $0x130] sm:$0xff] }
 0x2a5   : > { %1238 = vmatmul.bf16.gmra.mxu2 %v2709_v44 }
 0x2a6   : > { %1143 = vmatmul.bf16.gmra.mxu0 %v2690_v43  ;;  %v1311_v52 = vmax.f32 %v1105_v50, 0.0 }
 0x2a7   : > { %v1506_v46 = vpop.f32.mrf.mxu1 }
 0x2a8   : > { %v1507_v49 = vadd.f32 %v3474_v17, %v1506_v46  ;;  %v3513_v54 = vpop.eup %2763  ;;  %v2693_v46 = vld [vmem:[%s3131_s27 + $0xb0] sm:$0xff] }
 0x2aa   : > { %2765 = vtanh.f32 %v1507_v49 }
 0x2ab   : > { %v1106_v48 = vpop.f32.mrf.mxu0 }
 0x2ac   : > { %v1107_v51 = vadd.f32 %v3416_v57, %v1106_v48 }
 0x2ae   : > { %v1312_v53 = vmax.f32 %v1107_v51, 0.0 }
 0x2af   : > { %v1509_v56 = vpop.f32.mrf.mxu1 }
 0x2b0   : > { %v3515_v58 = vpop.eup %2765  ;;  %v3517_v59 = vpack.c.bf16 %v1312_v53, %v1311_v52  ;;  %v1510_v25 = vadd.f32 %v3474_v17, %v1509_v56 }
 0x2b1   : > { %v1833_v61 = vpack.c.bf16 %v3515_v58, %v3513_v54  ;;  %v2715_v58 = vld [vmem:[%s3131_s27 + $0x160] sm:$0xff] }
 0x2b2   : > { %4307 = vst [vmem:[#allocation10_spill] sm:$0xff] %v3517_v59  ;;  %1548 = vmatmul.bf16.gmra.mxu1 %v3517_v59  ;;  %2767 = vtanh.f32 %v1510_v25  ;;  %v2694_v25 = vld [vmem:[%s3131_s27 + $0xb8] sm:$0xff] }
 0x2b3   : > { %v1109_v29 = vpop.f32.mrf.mxu0 }
 0x2b4   : > { %v1110_v15 = vadd.f32 %v3416_v57, %v1109_v29  ;;  %v2710_v29 = vld [vmem:[%s3131_s27 + $0x138] sm:$0xff] }
 0x2b5   : > { %1243 = vmatmul.bf16.gmra.mxu2 %v2710_v29 }
 0x2b6   : > { %1148 = vmatmul.bf16.gmra.mxu0 %v2691_v62  ;;  %v1313_v11 = vmax.f32 %v1110_v15, 0.0 }
 0x2b7   : > { %v1511_v27 = vpop.f32.mrf.mxu1 }
 0x2b8   : > { %v1512_v13 = vadd.f32 %v3474_v17, %v1511_v27  ;;  %v3528_v1 = vpop.eup %2767 }
 0x2ba   : > { %2769 = vtanh.f32 %v1512_v13 }
 0x2bb   : > { %v1111_v5 = vpop.f32.mrf.mxu0 }
 0x2bc   : > { %v1112_v7 = vadd.f32 %v3416_v57, %v1111_v5 }
 0x2be   : > { %v1314_v19 = vmax.f32 %v1112_v7, 0.0 }
 0x2bf   : > { %v1514_v3 = vpop.f32.mrf.mxu1 }
 0x2c0   : > { %v3530_v23 = vpop.eup %2769  ;;  %v3532_v32 = vpack.c.bf16 %v1314_v19, %v1313_v11  ;;  %v1515_v28 = vadd.f32 %v3474_v17, %v1514_v3 }
 0x2c1   : > { %v1834_v35 = vpack.c.bf16 %v3530_v23, %v3528_v1 }
 0x2c2   : > { %1553 = vmatmul.bf16.gmra.mxu1 %v3532_v32  ;;  %2771 = vtanh.f32 %v1515_v28 }
 0x2c3   : > { %v1114_v41 = vpop.f32.mrf.mxu0 }
 0x2c4   : > { %v1115_v16 = vadd.f32 %v3416_v57, %v1114_v41  ;;  %v2695_v41 = vld [vmem:[%s3131_s27 + $0xc0] sm:$0xff] }
 0x2c6   : > { %1153 = vmatmul.bf16.gmra.mxu0 %v2692_v38  ;;  %v1315_v10 = vmax.f32 %v1115_v16, 0.0  ;;  %v2711_v38 = vld [vmem:[%s3131_s27 + $0x140] sm:$0xff] }
 0x2c7   : > { %v1516_v24 = vpop.f32.mrf.mxu1  ;;  %1248 = vmatmul.bf16.gmra.mxu2 %v2711_v38 }
 0x2c8   : > { %v1517_v20 = vadd.f32 %v3474_v17, %v1516_v24  ;;  %v3543_v4 = vpop.eup %2771 }
 0x2ca   : > { %2773 = vtanh.f32 %v1517_v20  ;;  %v1209_v20 = vpop.f32.mrf.mxu2 }
 0x2cb   : > { %v1116_v12 = vpop.f32.mrf.mxu0 }
 0x2cc   : > { %v1117_v8 = vadd.f32 %v3416_v57, %v1116_v12 }
 0x2ce   : > { %v1316_v18 = vmax.f32 %v1117_v8, 0.0 }
 0x2cf   : > { %v3545_v2 = vpop.f32.mrf.mxu1 }
 0x2d0   : > { %v3547_v30 = vpop.eup %2773  ;;  %v3549_v43 = vpack.c.bf16 %v1316_v18, %v1315_v10  ;;  %v1210_v18 = vadd.f32 %v3416_v57, %v1209_v20 }
 0x2d1   : > { %v1835_v45 = vpack.c.bf16 %v3547_v30, %v3543_v4  ;;  %v2714_v30 = vld [vmem:[%s3131_s27 + $0x158] sm:$0xff] }
 0x2d2   : > { %1558 = vmatmul.bf16.gmra.mxu1 %v3549_v43  ;;  %v1353_v29 = vmax.f32 %v1210_v18, 0.0 }
 0x2d3   : > { %v1119_v49 = vpop.f32.mrf.mxu0 }
 0x2d4   : > { %v1120_v48 = vadd.f32 %v3416_v57, %v1119_v49 }
 0x2d6   : > { %1158 = vmatmul.bf16.gmra.mxu0 %v2693_v46  ;;  %v1317_v53 = vmax.f32 %v1120_v48, 0.0 }
 0x2d7   : > { %v1521_v50 = vpop.f32.mrf.mxu1 }
 0x2d8   : > { %v1522_v38 = vadd.f32 %v3474_v17, %v1521_v50 }
 0x2db   : > { %v1121_v51 = vpop.f32.mrf.mxu0 }
 0x2dc   : > { %v1122_v52 = vadd.f32 %v3416_v57, %v1121_v51 }
 0x2de   : > { %v1318_v56 = vmax.f32 %v1122_v52, 0.0  ;;  %v1211_v52 = vpop.f32.mrf.mxu2 }
 0x2df   : > { %v1524_v60 = vpop.f32.mrf.mxu1 }
 0x2e0   : > { %v3558_v62 = vpack.c.bf16 %v1318_v56, %v1317_v53  ;;  %v1525_v49 = vadd.f32 %v3474_v17, %v1524_v60  ;;  %v2696_v60 = vld [vmem:[%s3131_s27 + $0xc8] sm:$0xff] }
 0x2e2   : > { %1563 = vmatmul.bf16.gmra.mxu1 %v3558_v62 }
 0x2e3   : > { %v1124_v27 = vpop.f32.mrf.mxu0 }
 0x2e4   : > { %v1125_v15 = vadd.f32 %v3416_v57, %v1124_v27 }
 0x2e6   : > { %1163 = vmatmul.bf16.gmra.mxu0 %v2694_v25  ;;  %v1319_v11 = vmax.f32 %v1125_v15, 0.0  ;;  %v1212_v25 = vadd.f32 %v3416_v57, %v1211_v52 }
 0x2e7   : > { %v1526_v13 = vpop.f32.mrf.mxu1 }
 0x2e8   : > { %v1527_v44 = vadd.f32 %v3474_v17, %v1526_v13  ;;  %v2712_v13 = vld [vmem:[%s3131_s27 + $0x148] sm:$0xff] }
 0x2e9   : > { %1253 = vmatmul.bf16.gmra.mxu2 %v2712_v13  ;;  %v2713_v13 = vld [vmem:[%s3131_s27 + $0x150] sm:$0xff] }
 0x2eb   : > { %v1126_v5 = vpop.f32.mrf.mxu0 }
 0x2ec   : > { %v1127_v7 = vadd.f32 %v3416_v57, %v1126_v5 }
 0x2ee   : > { %v1320_v19 = vmax.f32 %v1127_v7, 0.0  ;;  %v1354_v7 = vmax.f32 %v1212_v25, 0.0 }
 0x2ef   : > { %v1529_v3 = vpop.f32.mrf.mxu1 }
 0x2f0   : > { %v3565_v33 = vpack.c.bf16 %v1320_v19, %v1319_v11  ;;  %v1530_v24 = vadd.f32 %v3474_v17, %v1529_v3  ;;  %v1520_v11 = vadd.f32 %v3474_v17, %v3545_v2  ;;  %v3585_v3 = vpack.c.bf16 %v1354_v7, %v1353_v29 }
 0x2f2   : > { %1568 = vmatmul.bf16.gmra.mxu1 %v3565_v33  ;;  %2775 = vtanh.f32 %v1530_v24  ;;  %4308 = vst [vmem:[#allocation11_spill] sm:$0xff] %v3585_v3  ;;  %1653 = vmatmul.bf16.vlgmr.msra.gmra.mxu3 %v3585_v3  ;;  %v1214_v24 = vpop.f32.mrf.mxu2 }
 0x2f3   : > { %v1129_v28 = vpop.f32.mrf.mxu0 }
 0x2f4   : > { %v1130_v8 = vadd.f32 %v3416_v57, %v1129_v28 }
 0x2f6   : > { %1168 = vmatmul.bf16.gmra.mxu0 %v2695_v41  ;;  %v1321_v48 = vmax.f32 %v1130_v8, 0.0 }
 0x2f7   : > { %v1531_v16 = vpop.f32.mrf.mxu1 }
 0x2f8   : > { %v1532_v12 = vadd.f32 %v3474_v17, %v1531_v16  ;;  %v2776_v53 = vpop.eup %2775 }
 0x2f9   : > { %1258 = vmatmul.bf16.gmra.mxu2 %v2713_v13 }
 0x2fa   : > { %2777 = vtanh.f32 %v1532_v12 }
 0x2fb   : > { %v1131_v10 = vpop.f32.mrf.mxu0  ;;  %2779 = vtanh.f32 %v1527_v44 }
 0x2fc   : > { %v1132_v46 = vadd.f32 %v3416_v57, %v1131_v10  ;;  %2781 = vtanh.f32 %v1525_v49  ;;  %v1215_v10 = vadd.f32 %v3416_v57, %v1214_v24 }
 0x2fd   : > { %2783 = vtanh.f32 %v1520_v11  ;;  %v2697_v11 = vld [vmem:[%s3131_s27 + $0xd0] sm:$0xff] }
 0x2fe   : > { %v1322_v51 = vmax.f32 %v1132_v46, 0.0  ;;  %2785 = vtanh.f32 %v1522_v38 }
 0x2ff   : > { %v1534_v56 = vpop.f32.mrf.mxu1 }
 0x300   : > { %v2778_v27 = vpop.eup %2777  ;;  %v3578_v15 = vpack.c.bf16 %v1322_v51, %v1321_v48  ;;  %v1535_v41 = vadd.f32 %v3474_v17, %v1534_v56  ;;  %v1216_v51 = vpop.f32.mrf.mxu2  ;;  %v1355_v56 = vmax.f32 %v1215_v10, 0.0 }
 0x301   : > { %v1838_v5 = vpack.c.bf16 %v2778_v27, %v2776_v53  ;;  %v2780_v28 = vpop.eup %2779  ;;  %v1217_v29 = vadd.f32 %v3416_v57, %v1216_v51 }
 0x302   : > { %1573 = vmatmul.bf16.gmra.mxu1 %v3578_v15  ;;  %v2782_v16 = vpop.eup %2781  ;;  %2787 = vtanh.f32 %v1535_v41 }
 0x303   : > { %v1134_v19 = vpop.f32.mrf.mxu0  ;;  %1879 = vmatpush.bf16.xpose.msrb.mxu2 %v1838_v5  ;;  %v1837_v12 = vpack.c.bf16 %v2780_v28, %v2782_v16  ;;  %v2784_v44 = vpop.eup %2783  ;;  %v1356_v7 = vmax.f32 %v1217_v29, 0.0 }
 0x304   : > { %v1135_v8 = vadd.f32 %v3416_v57, %v1134_v19  ;;  %v2786_v46 = vpop.eup %2785 }
 0x305   : > { %v1836_v5 = vpack.c.bf16 %v2786_v46, %v2784_v44  ;;  %v3606_v38 = vpack.c.bf16 %v1356_v7, %v1355_v56  ;;  %v2698_v56 = vld [vmem:[%s3131_s27 + $0xd8] sm:$0xff] }
 0x306   : > { %1173 = vmatmul.bf16.gmra.mxu0 %v2696_v60  ;;  %v1323_v49 = vmax.f32 %v1135_v8, 0.0 }
 0x307   : > { %v1536_v20 = vpop.f32.mrf.mxu1  ;;  %4309 = vst [vmem:[#allocation8_spill] sm:$0xff] %v3606_v38  ;;  %1658 = vmatmul.bf16.gmra.mxu3 %v3606_v38 }
 0x308   : > { %v1537_v2 = vadd.f32 %v3474_v17, %v1536_v20  ;;  %v3594_v52 = vpop.eup %2787  ;;  %v1219_v28 = vpop.f32.mrf.mxu2 }
 0x309   : > { %1263 = vmatmul.bf16.gmra.mxu2 %v2714_v30 }
 0x30a   : > { %2789 = vtanh.f32 %v1537_v2 }
 0x30b   : > { %v1136_v50 = vpop.f32.mrf.mxu0  ;;  %1880 = vmatpush.bf16.xpose.msrb.mxu2 %v1837_v12  ;;  %v1220_v12 = vadd.f32 %v3416_v57, %v1219_v28 }
 0x30c   : > { %v1137_v18 = vadd.f32 %v3416_v57, %v1136_v50 }
 0x30e   : > { %v1324_v48 = vmax.f32 %v1137_v18, 0.0 }
 0x30f   : > { %v1539_v53 = vpop.f32.mrf.mxu1 }
 0x310   : > { %v3597_v25 = vpop.eup %2789  ;;  %v3599_v27 = vpack.c.bf16 %v1324_v48, %v1323_v49  ;;  %v1540_v41 = vadd.f32 %v3474_v17, %v1539_v53  ;;  %v1221_v18 = vpop.f32.mrf.mxu2  ;;  %v1357_v49 = vmax.f32 %v1220_v12, 0.0 }
 0x311   : > { %v1222_v48 = vadd.f32 %v3416_v57, %v1221_v18  ;;  %v2699_v18 = vld [vmem:[%s3131_s27 + $0xe0] sm:$0xff] }
 0x312   : > { %1578 = vmatmul.bf16.gmra.mxu1 %v3599_v27  ;;  %2791 = vtanh.f32 %v1540_v41 }
 0x313   : > { %v1139_v19 = vpop.f32.mrf.mxu0  ;;  %1881 = vmatpush.bf16.xpose.msrb.mxu2 %v1836_v5  ;;  %v1358_v4 = vmax.f32 %v1222_v48, 0.0 }
 0x314   : > { %v1140_v16 = vadd.f32 %v3416_v57, %v1139_v19 }
 0x315   : > { %v3632_v5 = vpack.c.bf16 %v1358_v4, %v1357_v49 }
 0x316   : > { %1178 = vmatmul.bf16.gmra.mxu0 %v2697_v11  ;;  %v1325_v50 = vmax.f32 %v1140_v16, 0.0 }
 0x317   : > { %v1541_v24 = vpop.f32.mrf.mxu1  ;;  %4310 = vst [vmem:[#allocation9_spill] sm:$0xff] %v3632_v5  ;;  %1663 = vmatmul.bf16.gmra.mxu3 %v3632_v5 }
 0x318   : > { %v1542_v20 = vadd.f32 %v3474_v17, %v1541_v24  ;;  %v3617_v44 = vpop.eup %2791  ;;  %v1224_v13 = vpop.f32.mrf.mxu2 }
 0x319   : > { %v1225_v1 = vadd.f32 %v3416_v57, %v1224_v13  ;;  %1268 = vmatmul.bf16.gmra.mxu2 %v2715_v58 }
 0x31a   : > { %2793 = vtanh.f32 %v1542_v20 }
 0x31b   : > { %v1141_v2 = vpop.f32.mrf.mxu0  ;;  %1882 = vmatpush.bf16.xpose.msrb.mxu2 %v1835_v45  ;;  %v1359_v12 = vmax.f32 %v1225_v1, 0.0 }
 0x31c   : > { %v1142_v8 = vadd.f32 %v3416_v57, %v1141_v2 }
 0x31e   : > { %v1326_v10 = vmax.f32 %v1142_v8, 0.0 }
 0x31f   : > { %v1544_v46 = vpop.f32.mrf.mxu1 }
 0x320   : > { %v3620_v51 = vpop.eup %2793  ;;  %v3622_v53 = vpack.c.bf16 %v1326_v10, %v1325_v50  ;;  %v1545_v7 = vadd.f32 %v3474_v17, %v1544_v46  ;;  %v1226_v20 = vpop.f32.mrf.mxu2 }
 0x321   : > { %v1227_v8 = vadd.f32 %v3416_v57, %v1226_v20 }
 0x322   : > { %1583 = vmatmul.bf16.gmra.mxu1 %v3622_v53  ;;  %2795 = vtanh.f32 %v1545_v7 }
 0x323   : > { %v1144_v29 = vpop.f32.mrf.mxu0  ;;  %1883 = vmatpush.bf16.xpose.msrb.mxu2 %v1834_v35  ;;  %v1360_v54 = vmax.f32 %v1227_v8, 0.0 }
 0x324   : > { %v1145_v41 = vadd.f32 %v3416_v57, %v1144_v29 }
 0x325   : > { %v3658_v49 = vpack.c.bf16 %v1360_v54, %v1359_v12 }
 0x326   : > { %1183 = vmatmul.bf16.gmra.mxu0 %v2698_v56  ;;  %v1327_v35 = vmax.f32 %v1145_v41, 0.0 }
 0x327   : > { %v1546_v11 = vpop.f32.mrf.mxu1  ;;  %4311 = vst [vmem:[#allocation6_spill] sm:$0xff] %v3658_v49  ;;  %1668 = vmatmul.bf16.gmra.mxu3 %v3658_v49 }
 0x328   : > { %v1547_v19 = vadd.f32 %v3474_v17, %v1546_v11  ;;  %v3643_v16 = vpop.eup %2795  ;;  %v1229_v4 = vpop.f32.mrf.mxu2 }
 0x329   : > { %v1230_v0 = vadd.f32 %v3416_v57, %v1229_v4  ;;  %1273 = vmatmul.bf16.gmra.mxu2 %v2716_v36 }
 0x32a   : > { %2797 = vtanh.f32 %v1547_v19 }
 0x32b   : > { %v1146_v28 = vpop.f32.mrf.mxu0  ;;  %1884 = vmatpush.bf16.xpose.msrb.mxu2 %v1833_v61 }
 0x32c   : > { %v1147_v23 = vadd.f32 %v3416_v57, %v1146_v28  ;;  %v1361_v28 = vmax.f32 %v1230_v0, 0.0 }
 0x32e   : > { %v1328_v24 = vmax.f32 %v1147_v23, 0.0 }
 0x32f   : > { %v1549_v2 = vpop.f32.mrf.mxu1 }
 0x330   : > { %v3646_v50 = vpop.eup %2797  ;;  %v3648_v10 = vpack.c.bf16 %v1328_v24, %v1327_v35  ;;  %v1550_v48 = vadd.f32 %v3474_v17, %v1549_v2  ;;  %v1231_v11 = vpop.f32.mrf.mxu2  ;;  %v2700_v24 = vld [vmem:[%s3131_s27 + $0xe8] sm:$0xff] }
 0x331   : > { %v1232_v1 = vadd.f32 %v3416_v57, %v1231_v11 }
 0x332   : > { %1588 = vmatmul.bf16.gmra.mxu1 %v3648_v10  ;;  %2799 = vtanh.f32 %v1550_v48 }
 0x333   : > { %v1149_v46 = vpop.f32.mrf.mxu0  ;;  %1885 = vmatpush.bf16.xpose.msrb.mxu2 %v1832_v42  ;;  %v1362_v34 = vmax.f32 %v1232_v1, 0.0 }
 0x334   : > { %v1150_v29 = vadd.f32 %v3416_v57, %v1149_v46 }
 0x335   : > { %v3681_v2 = vpack.c.bf16 %v1362_v34, %v1361_v28  ;;  %v2717_v28 = vld [vmem:[%s3131_s27 + $0x170] sm:$0xff] }
 0x336   : > { %1188 = vmatmul.bf16.gmra.mxu0 %v2699_v18  ;;  %v1329_v42 = vmax.f32 %v1150_v29, 0.0  ;;  %v2701_v34 = vld [vmem:[%s3131_s27 + $0xf0] sm:$0xff] }
 0x337   : > { %v1551_v30 = vpop.f32.mrf.mxu1  ;;  %4312 = vst [vmem:[#allocation7_spill] sm:$0xff] %v3681_v2  ;;  %1673 = vmatmul.bf16.gmra.mxu3 %v3681_v2 }
 0x338   : > { %v1552_v56 = vadd.f32 %v3474_v17, %v1551_v30  ;;  %v3669_v19 = vpop.eup %2799  ;;  %v1234_v8 = vpop.f32.mrf.mxu2 }
 0x339   : > { %v1235_v48 = vadd.f32 %v3416_v57, %v1234_v8  ;;  %1278 = vmatmul.bf16.gmra.mxu2 %v2717_v28  ;;  %v2702_v28 = vld [vmem:[%s3131_s27 + $0xf8] sm:$0xff] }
 0x33a   : > { %2801 = vtanh.f32 %v1552_v56 }
 0x33b   : > { %v1151_v7 = vpop.f32.mrf.mxu0  ;;  %1886 = vmatpush.bf16.xpose.msrb.mxu2 %v1831_v40 }
 0x33c   : > { %v1152_v6 = vadd.f32 %v3416_v57, %v1151_v7 }
 0x33e   : > { %v1330_v13 = vmax.f32 %v1152_v6, 0.0  ;;  %v1363_v6 = vmax.f32 %v1235_v48, 0.0 }
 0x33f   : > { %v1554_v41 = vpop.f32.mrf.mxu1 }
 0x340   : > { %v3672_v23 = vpop.eup %2801  ;;  %v3674_v35 = vpack.c.bf16 %v1330_v13, %v1329_v42  ;;  %v1555_v12 = vadd.f32 %v3474_v17, %v1554_v41  ;;  %v1236_v29 = vpop.f32.mrf.mxu2 }
 0x341   : > { %v1237_v42 = vadd.f32 %v3416_v57, %v1236_v29 }
 0x342   : > { %1593 = vmatmul.bf16.gmra.mxu1 %v3674_v35  ;;  %2803 = vtanh.f32 %v1555_v12 }
 0x343   : > { %v1154_v20 = vpop.f32.mrf.mxu0  ;;  %v1364_v41 = vmax.f32 %v1237_v42, 0.0 }
 0x344   : > { %v1155_v18 = vadd.f32 %v3416_v57, %v1154_v20 }
 0x346   : > { %1193 = vmatmul.bf16.gmra.mxu0 %v2700_v24  ;;  %v1331_v30 = vmax.f32 %v1155_v18, 0.0  ;;  %v3703_v24 = vpack.c.bf16 %v1364_v41, %v1363_v6  ;;  %v2718_v41 = vld [vmem:[%s3131_s27 + $0x178] sm:$0xff] }
 0x347   : > { %v1556_v54 = vpop.f32.mrf.mxu1 }
 0x348   : > { %v1557_v58 = vadd.f32 %v3474_v17, %v1556_v54  ;;  %v3689_v7 = vpop.eup %2803  ;;  %4313 = vst [vmem:[#allocation15_spill] sm:$0xff] %v3703_v24  ;;  %1678 = vmatmul.bf16.gmra.mxu3 %v3703_v24  ;;  %v1239_v20 = vpop.f32.mrf.mxu2 }
 0x349   : > { %1283 = vmatmul.bf16.gmra.mxu2 %v2718_v41 }
 0x34a   : > { %2805 = vtanh.f32 %v1557_v58  ;;  %v1240_v58 = vadd.f32 %v3416_v57, %v1239_v20 }
 0x34b   : > { %v1156_v46 = vpop.f32.mrf.mxu0 }
 0x34c   : > { %v1157_v4 = vadd.f32 %v3416_v57, %v1156_v46 }
 0x34e   : > { %v1332_v56 = vmax.f32 %v1157_v4, 0.0 }
 0x34f   : > { %v3691_v0 = vpop.f32.mrf.mxu1 }
 0x350   : > { %v3694_v13 = vpop.eup %2805  ;;  %v3696_v11 = vpack.c.bf16 %v1332_v56, %v1331_v30  ;;  %v1241_v4 = vpop.f32.mrf.mxu2  ;;  %v1365_v56 = vmax.f32 %v1240_v58, 0.0 }
 0x351   : > { %v1242_v29 = vadd.f32 %v3416_v57, %v1241_v4 }
 0x352   : > { %1598 = vmatmul.bf16.gmra.mxu1 %v3696_v11 }
 0x353   : > { %v1159_v36 = vpop.f32.mrf.mxu0  ;;  %v1366_v42 = vmax.f32 %v1242_v29, 0.0 }
 0x354   : > { %v1160_v8 = vadd.f32 %v3416_v57, %v1159_v36 }
 0x355   : > { %v3717_v36 = vpack.c.bf16 %v1366_v42, %v1365_v56 }
 0x356   : > { %1198 = vmatmul.bf16.gmra.mxu0 %v2701_v34  ;;  %v1333_v46 = vmax.f32 %v1160_v8, 0.0 }
 0x357   : > { %v3706_v12 = vpop.f32.mrf.mxu1  ;;  %4314 = vst [vmem:[#allocation16_spill] sm:$0xff] %v3717_v36 }
 0x358   : > { %1683 = vmatmul.bf16.gmra.mxu3 %v3717_v36  ;;  %v1244_v20 = vpop.f32.mrf.mxu2 }
 0x35b   : > { %v1161_v54 = vpop.f32.mrf.mxu0 }
 0x35c   : > { %v1162_v18 = vadd.f32 %v3416_v57, %v1161_v54 }
 0x35e   : > { %v1334_v48 = vmax.f32 %v1162_v18, 0.0  ;;  %v1245_v18 = vadd.f32 %v3416_v57, %v1244_v20 }
 0x35f   : > { %v1564_v30 = vpop.f32.mrf.mxu1 }
 0x360   : > { %v3712_v6 = vpack.c.bf16 %v1334_v48, %v1333_v46  ;;  %v1246_v29 = vpop.f32.mrf.mxu2  ;;  %v1367_v45 = vmax.f32 %v1245_v18, 0.0 }
 0x361   : > { %v1247_v56 = vadd.f32 %v3416_v57, %v1246_v29  ;;  %v1565_v29 = vadd.f32 %v3474_v17, %v1564_v30  ;;  %v1560_v30 = vadd.f32 %v3474_v17, %v3691_v0 }
 0x362   : > { %1603 = vmatmul.bf16.gmra.mxu1 %v3712_v6 }
 0x363   : > { %v1164_v34 = vpop.f32.mrf.mxu0  ;;  %v1368_v41 = vmax.f32 %v1247_v56, 0.0 }
 0x364   : > { %v1165_v54 = vadd.f32 %v3416_v57, %v1164_v34 }
 0x365   : > { %v3727_v61 = vpack.c.bf16 %v1368_v41, %v1367_v45 }
 0x366   : > { %1203 = vmatmul.bf16.gmra.mxu0 %v2702_v28  ;;  %v1335_v48 = vmax.f32 %v1165_v54, 0.0 }
 0x367   : > { %v1566_v8 = vpop.f32.mrf.mxu1  ;;  %4315 = vst [vmem:[#allocation17_spill] sm:$0xff] %v3727_v61 }
 0x368   : > { %1688 = vmatmul.bf16.gmra.mxu3 %v3727_v61  ;;  %v1249_v20 = vpop.f32.mrf.mxu2 }
 0x36b   : > { %v1166_v58 = vpop.f32.mrf.mxu0 }
 0x36c   : > { %v1167_v46 = vadd.f32 %v3416_v57, %v1166_v58 }
 0x36e   : > { %v1336_v4 = vmax.f32 %v1167_v46, 0.0 }
 0x36f   : > { %v1569_v60 = vpop.f32.mrf.mxu1 }
 0x370   : > { %v3724_v42 = vpack.c.bf16 %v1336_v4, %v1335_v48  ;;  %v1570_v34 = vadd.f32 %v3474_v17, %v1569_v60  ;;  %v1250_v48 = vadd.f32 %v3416_v57, %v1249_v20  ;;  %v1567_v4 = vadd.f32 %v3474_v17, %v1566_v8  ;;  %v1251_v41 = vpop.f32.mrf.mxu2 }
 0x372   : > { %1608 = vmatmul.bf16.gmra.mxu1 %v3724_v42  ;;  %2807 = vtanh.f32 %v1570_v34  ;;  %v1369_v3 = vmax.f32 %v1250_v48, 0.0  ;;  %v1252_v34 = vadd.f32 %v3416_v57, %v1251_v41 }
 0x373   : > { %v1169_v28 = vpop.f32.mrf.mxu0 }
 0x374   : > { %v1170_v18 = vadd.f32 %v3416_v57, %v1169_v28  ;;  %v1370_v20 = vmax.f32 %v1252_v34, 0.0 }
 0x375   : > { %v1654_v0 = vpop.f32.mrf.mxu3 }
 0x376   : > { %v1337_v60 = vmax.f32 %v1170_v18, 0.0  ;;  %v3743_v18 = vpack.c.bf16 %v1370_v20, %v1369_v3 }
 0x377   : > { %v1571_v54 = vpop.f32.mrf.mxu1 }
 0x378   : > { %v1572_v58 = vadd.f32 %v3474_v17, %v1571_v54  ;;  %v2808_v40 = vpop.eup %2807  ;;  %4317 = vst [vmem:[#allocation19_spill] sm:$0xff] %v3743_v18  ;;  %1693 = vmatmul.bf16.gmra.mxu3 %v3743_v18 }
 0x37a   : > { %2809 = vtanh.f32 %v1572_v58 }
 0x37b   : > { %v1171_v46 = vpop.f32.mrf.mxu0  ;;  %2811 = vtanh.f32 %v1567_v4 }
 0x37c   : > { %v1172_v45 = vadd.f32 %v3416_v57, %v1171_v46  ;;  %2813 = vtanh.f32 %v1565_v29  ;;  %v1562_v46 = vadd.f32 %v3474_v17, %v3706_v12 }
 0x37d   : > { %2815 = vtanh.f32 %v1560_v30 }
 0x37e   : > { %v1338_v56 = vmax.f32 %v1172_v45, 0.0  ;;  %v1254_v45 = vpop.f32.mrf.mxu2  ;;  %2817 = vtanh.f32 %v1562_v46 }
 0x37f   : > { %v1574_v1 = vpop.f32.mrf.mxu1 }
 0x380   : > { %v2810_v54 = vpop.eup %2809  ;;  %v3738_v28 = vpack.c.bf16 %v1338_v56, %v1337_v60  ;;  %v1575_v48 = vadd.f32 %v3474_v17, %v1574_v1  ;;  %v3754_v1 = vld [vmem:[%s4249_s4] ss:$0 sm:$0xff] }
 0x381   : > { %v1846_v58 = vpack.c.bf16 %v2810_v54, %v2808_v40  ;;  %v2812_v4 = vpop.eup %2811  ;;  %v1255_v34 = vadd.f32 %v3754_v1, %v1254_v45 }
 0x382   : > { %4316 = vst [vmem:[#allocation18_spill] sm:$0xff] %v3738_v28  ;;  %1613 = vmatmul.bf16.gmra.mxu1 %v3738_v28  ;;  %v2814_v29 = vpop.eup %2813  ;;  %2819 = vtanh.f32 %v1575_v48 }
 0x383   : > { %v1174_v8 = vpop.f32.mrf.mxu0  ;;  %1892 = vmatpush.bf16.xpose.msrb.mxu3 %v1846_v58  ;;  %v1845_v56 = vpack.c.bf16 %v2812_v4, %v2814_v29  ;;  %v2816_v54 = vpop.eup %2815  ;;  %v1655_v58 = vadd.f32 %v3474_v17, %v1654_v0  ;;  %v1371_v29 = vmax.f32 %v1255_v34, 0.0 }
 0x384   : > { %v1175_v3 = vadd.f32 %v3416_v57, %v1174_v8  ;;  %v2818_v20 = vpop.eup %2817 }
 0x386   : > { %v1339_v30 = vmax.f32 %v1175_v3, 0.0  ;;  %v1256_v8 = vpop.f32.mrf.mxu2 }
 0x387   : > { %v1576_v40 = vpop.f32.mrf.mxu1 }
 0x388   : > { %v1577_v60 = vadd.f32 %v3474_v17, %v1576_v40  ;;  %v3759_v48 = vpop.eup %2819 }
 0x38a   : > { %2821 = vtanh.f32 %v1577_v60  ;;  %v1257_v60 = vadd.f32 %v3754_v1, %v1256_v8 }
 0x38b   : > { %v1176_v41 = vpop.f32.mrf.mxu0  ;;  %1893 = vmatpush.bf16.xpose.msrb.mxu3 %v1845_v56  ;;  %v1656_v56 = vpop.f32.mrf.mxu3  ;;  %2823 = vtanh.f32 %v1655_v58 }
 0x38c   : > { %v1177_v12 = vadd.f32 %v3754_v1, %v1176_v41  ;;  %v1844_v41 = vpack.c.bf16 %v2818_v20, %v2816_v54  ;;  %v1657_v45 = vadd.f32 %v3474_v17, %v1656_v56  ;;  %v1372_v3 = vmax.f32 %v1257_v60, 0.0 }
 0x38e   : > { %v1340_v46 = vmax.f32 %v1177_v12, 0.0  ;;  %2825 = vtanh.f32 %v1657_v45  ;;  %v3770_v18 = vpack.c.bf16 %v1372_v3, %v1371_v29  ;;  %v1259_v58 = vpop.f32.mrf.mxu2 }
 0x38f   : > { %v1579_v57 = vpop.f32.mrf.mxu1  ;;  %v1260_v45 = vadd.f32 %v3754_v1, %v1259_v58 }
 0x390   : > { %v3761_v4 = vpop.eup %2821  ;;  %v3763_v40 = vpack.c.bf16 %v1340_v46, %v1339_v30  ;;  %4319 = vst [vmem:[#allocation21_spill] sm:$0xff] %v3770_v18  ;;  %v1580_v34 = vadd.f32 %v3474_v17, %v1579_v57  ;;  %1698 = vmatmul.bf16.gmra.mxu3 %v3770_v18  ;;  %v4320_v57 = vpack.c.bf16 %v3694_v13, %v3689_v7 }
 0x391   : > { %v3774_v30 = vpop.eup %2823  ;;  %v1373_v38 = vmax.f32 %v1260_v45, 0.0 }
 0x392   : > { %4318 = vst [vmem:[#allocation20_spill] sm:$0xff] %v3763_v40  ;;  %1618 = vmatmul.bf16.gmra.mxu1 %v3763_v40  ;;  %2827 = vtanh.f32 %v1580_v34 }
 0x393   : > { %v1179_v12 = vpop.f32.mrf.mxu0  ;;  %1894 = vmatpush.bf16.xpose.msrb.mxu3 %v1844_v41  ;;  %v1659_v46 = vpop.f32.mrf.mxu3 }
 0x394   : > { %v3777_v8 = vpop.eup %2825  ;;  %v1180_v60 = vadd.f32 %v3754_v1, %v1179_v12  ;;  %v1660_v3 = vadd.f32 %v3474_v17, %v1659_v46 }
 0x397   : > { %v1581_v54 = vpop.f32.mrf.mxu1 }
 0x398   : > { %v1582_v20 = vadd.f32 %v3474_v17, %v1581_v54  ;;  %v1341_v54 = vmax.f32 %v1180_v60, 0.0  ;;  %v3788_v34 = vpop.eup %2827 }
 0x39a   : > { %2829 = vtanh.f32 %v1582_v20  ;;  %v1261_v20 = vpop.f32.mrf.mxu2 }
 0x39b   : > { %v1181_v56 = vpop.f32.mrf.mxu0  ;;  %1895 = vmatpush.bf16.xpose.msrb.mxu3 %v4320_v57  ;;  %v1262_v7 = vadd.f32 %v3754_v1, %v1261_v20  ;;  %v1661_v13 = vpop.f32.mrf.mxu3  ;;  %2831 = vtanh.f32 %v1660_v3  ;;  %v4322_v57 = vpack.c.bf16 %v3672_v23, %v3669_v19 }
 0x39c   : > { %v1182_v41 = vadd.f32 %v3754_v1, %v1181_v56  ;;  %v1662_v56 = vadd.f32 %v3474_v17, %v1661_v13 }
 0x39d   : > { %v1374_v46 = vmax.f32 %v1262_v7, 0.0 }
 0x39e   : > { %v1342_v0 = vmax.f32 %v1182_v41, 0.0  ;;  %2833 = vtanh.f32 %v1662_v56 }
 0x39f   : > { %v1584_v12 = vpop.f32.mrf.mxu1 }
 0x3a0   : > { %v3790_v18 = vpop.eup %2829  ;;  %v3792_v29 = vpack.c.bf16 %v1342_v0, %v1341_v54  ;;  %v3802_v0 = vpack.c.bf16 %v1374_v46, %v1373_v38  ;;  %v1585_v41 = vadd.f32 %v3474_v17, %v1584_v12  ;;  %v4324_v12 = vpack.c.bf16 %v3646_v50, %v3643_v16 }
 0x3a1   : > { %v3806_v45 = vpop.eup %2831 }
 0x3a2   : > { %4321 = vst [vmem:[#allocation22_spill] sm:$0xff] %v3792_v29  ;;  %1623 = vmatmul.bf16.gmra.mxu1 %v3792_v29  ;;  %1703 = vmatmul.bf16.gmra.mxu3 %v3802_v0  ;;  %v1264_v54 = vpop.f32.mrf.mxu2  ;;  %2835 = vtanh.f32 %v1585_v41 }
 0x3a3   : > { %v1184_v60 = vpop.f32.mrf.mxu0  ;;  %1896 = vmatpush.bf16.xpose.msrb.mxu3 %v4322_v57  ;;  %4323 = vst [vmem:[#allocation23_spill] sm:$0xff] %v3802_v0  ;;  %v1664_v13 = vpop.f32.mrf.mxu3  ;;  %v1265_v46 = vadd.f32 %v3754_v1, %v1264_v54  ;;  %v3830_v54 = vld [vmem:[%s4251_s6] ss:$0 sm:$0xff] }
 0x3a4   : > { %v3809_v7 = vpop.eup %2833  ;;  %v1185_v19 = vadd.f32 %v3754_v1, %v1184_v60  ;;  %v1665_v57 = vadd.f32 %v3474_v17, %v1664_v13 }
 0x3a5   : > { %v1375_v5 = vmax.f32 %v1265_v46, 0.0 }
 0x3a7   : > { %v1586_v3 = vpop.f32.mrf.mxu1 }
 0x3a8   : > { %v1587_v20 = vadd.f32 %v3474_v17, %v1586_v3  ;;  %v1343_v3 = vmax.f32 %v1185_v19, 0.0  ;;  %v3820_v41 = vpop.eup %2835 }
 0x3aa   : > { %2837 = vtanh.f32 %v1587_v20  ;;  %v1266_v20 = vpop.f32.mrf.mxu2 }
 0x3ab   : > { %v1186_v23 = vpop.f32.mrf.mxu0  ;;  %1897 = vmatpush.bf16.xpose.msrb.mxu3 %v4324_v12  ;;  %v1267_v16 = vadd.f32 %v3754_v1, %v1266_v20  ;;  %v1666_v50 = vpop.f32.mrf.mxu3  ;;  %2839 = vtanh.f32 %v1665_v57 }
 0x3ac   : > { %v1187_v56 = vadd.f32 %v3754_v1, %v1186_v23  ;;  %v1667_v17 = vadd.f32 %v3830_v54, %v1666_v50  ;;  %v4326_v23 = vpack.c.bf16 %v3620_v51, %v3617_v44 }
 0x3ad   : > { %v1376_v19 = vmax.f32 %v1267_v16, 0.0 }
 0x3ae   : > { %v1344_v58 = vmax.f32 %v1187_v56, 0.0  ;;  %2841 = vtanh.f32 %v1667_v17 }
 0x3af   : > { %v1589_v60 = vpop.f32.mrf.mxu1  ;;  %v3839_v12 = vpack.c.bf16 %v1376_v19, %v1375_v5 }
 0x3b0   : > { %v3822_v0 = vpop.eup %2837  ;;  %v3824_v38 = vpack.c.bf16 %v1344_v58, %v1343_v3  ;;  %v1590_v56 = vadd.f32 %v3830_v54, %v1589_v60  ;;  %v4328_v60 = vpack.c.bf16 %v3597_v25, %v3594_v52 }
 0x3b1   : > { %4327 = vst [vmem:[#allocation25_spill] sm:$0xff] %v3839_v12  ;;  %v3843_v46 = vpop.eup %2839 }
 0x3b2   : > { %4325 = vst [vmem:[#allocation24_spill] sm:$0xff] %v3824_v38  ;;  %1628 = vmatmul.bf16.gmra.mxu1 %v3824_v38  ;;  %1708 = vmatmul.bf16.gmra.mxu3 %v3839_v12  ;;  %v1269_v3 = vpop.f32.mrf.mxu2  ;;  %2843 = vtanh.f32 %v1590_v56 }
 0x3b3   : > { %v1189_v58 = vpop.f32.mrf.mxu0  ;;  %1898 = vmatpush.bf16.xpose.msrb.mxu3 %v4326_v23  ;;  %v1669_v50 = vpop.f32.mrf.mxu3  ;;  %v1270_v19 = vadd.f32 %v3754_v1, %v1269_v3 }
 0x3b4   : > { %v3846_v16 = vpop.eup %2841  ;;  %v1190_v44 = vadd.f32 %v3754_v1, %v1189_v58  ;;  %v1670_v23 = vadd.f32 %v3830_v54, %v1669_v50 }
 0x3b5   : > { %v1377_v49 = vmax.f32 %v1270_v19, 0.0 }
 0x3b7   : > { %v1591_v57 = vpop.f32.mrf.mxu1 }
 0x3b8   : > { %v1592_v20 = vadd.f32 %v3830_v54, %v1591_v57  ;;  %v1345_v57 = vmax.f32 %v1190_v44, 0.0  ;;  %v3857_v56 = vpop.eup %2843 }
 0x3ba   : > { %2845 = vtanh.f32 %v1592_v20  ;;  %v1271_v20 = vpop.f32.mrf.mxu2 }
 0x3bb   : > { %v1191_v5 = vpop.f32.mrf.mxu0  ;;  %1899 = vmatpush.bf16.xpose.msrb.mxu3 %v4328_v60  ;;  %v1272_v52 = vadd.f32 %v3754_v1, %v1271_v20  ;;  %v1671_v25 = vpop.f32.mrf.mxu3  ;;  %2847 = vtanh.f32 %v1670_v23 }
 0x3bc   : > { %v1192_v17 = vadd.f32 %v3754_v1, %v1191_v5  ;;  %v1672_v5 = vadd.f32 %v3830_v54, %v1671_v25 }
 0x3bd   : > { %v1378_v50 = vmax.f32 %v1272_v52, 0.0 }
 0x3be   : > { %v1346_v13 = vmax.f32 %v1192_v17, 0.0  ;;  %2849 = vtanh.f32 %v1672_v5 }
 0x3bf   : > { %v1594_v58 = vpop.f32.mrf.mxu1  ;;  %v3868_v60 = vpack.c.bf16 %v1378_v50, %v1377_v49 }
 0x3c0   : > { %v3859_v12 = vpop.eup %2845  ;;  %v3861_v51 = vpack.c.bf16 %v1346_v13, %v1345_v57  ;;  %v1595_v13 = vadd.f32 %v3830_v54, %v1594_v58 }
 0x3c1   : > { %4330 = vst [vmem:[#allocation27_spill] sm:$0xff] %v3868_v60  ;;  %v3872_v17 = vpop.eup %2847 }
 0x3c2   : > { %4329 = vst [vmem:[#allocation26_spill] sm:$0xff] %v3861_v51  ;;  %1633 = vmatmul.bf16.gmra.mxu1 %v3861_v51  ;;  %1713 = vmatmul.bf16.gmra.mxu3 %v3868_v60  ;;  %v1274_v23 = vpop.f32.mrf.mxu2  ;;  %2851 = vtanh.f32 %v1595_v13 }
 0x3c3   : > { %v1194_v44 = vpop.f32.mrf.mxu0  ;;  %v3875_v20 = vpop.f32.mrf.mxu3  ;;  %v1275_v50 = vadd.f32 %v3754_v1, %v1274_v23 }
 0x3c4   : > { %v3877_v25 = vpop.eup %2849  ;;  %v1195_v52 = vadd.f32 %v3754_v1, %v1194_v44 }
 0x3c5   : > { %v1379_v44 = vmax.f32 %v1275_v50, 0.0 }
 0x3c6   : > { %v1347_v3 = vmax.f32 %v1195_v52, 0.0 }
 0x3c7   : > { %v1596_v19 = vpop.f32.mrf.mxu1 }
 0x3c8   : > { %v1597_v57 = vadd.f32 %v3830_v54, %v1596_v19  ;;  %v3884_v2 = vpop.eup %2851 }
 0x3ca   : > { %2853 = vtanh.f32 %v1597_v57  ;;  %v1276_v24 = vpop.f32.mrf.mxu2 }
 0x3cb   : > { %v1196_v58 = vpop.f32.mrf.mxu0  ;;  %v1277_v57 = vadd.f32 %v3754_v1, %v1276_v24  ;;  %v3893_v49 = vpop.f32.mrf.mxu3 }
 0x3cc   : > { %v1197_v5 = vadd.f32 %v3754_v1, %v1196_v58 }
 0x3cd   : > { %v1380_v23 = vmax.f32 %v1277_v57, 0.0 }
 0x3ce   : > { %v1348_v60 = vmax.f32 %v1197_v5, 0.0 }
 0x3cf   : > { %v3886_v19 = vpop.f32.mrf.mxu1  ;;  %v3898_v5 = vpack.c.bf16 %v1380_v23, %v1379_v44 }
 0x3d0   : > { %v3888_v36 = vpop.eup %2853  ;;  %v3890_v13 = vpack.c.bf16 %v1348_v60, %v1347_v3 }
 0x3d1   : > { %4332 = vst [vmem:[#allocation29_spill] sm:$0xff] %v3898_v5 }
 0x3d2   : > { %4331 = vst [vmem:[#allocation28_spill] sm:$0xff] %v3890_v13  ;;  %1638 = vmatmul.bf16.gmra.mxu1 %v3890_v13  ;;  %1718 = vmatmul.bf16.gmra.mxu3 %v3898_v5  ;;  %v1279_v28 = vpop.f32.mrf.mxu2 }
 0x3d3   : > { %v1199_v52 = vpop.f32.mrf.mxu0  ;;  %v3901_v3 = vpop.f32.mrf.mxu3  ;;  %v1280_v40 = vadd.f32 %v3754_v1, %v1279_v28 }
 0x3d4   : > { %v1200_v60 = vadd.f32 %v3754_v1, %v1199_v52 }
 0x3d5   : > { %v1381_v44 = vmax.f32 %v1280_v40, 0.0 }
 0x3d6   : > { %v1349_v58 = vmax.f32 %v1200_v60, 0.0 }
 0x3d7   : > { %v1601_v61 = vpop.f32.mrf.mxu1 }
 0x3da   : > { %v1281_v57 = vpop.f32.mrf.mxu2 }
 0x3db   : > { %v1201_v24 = vpop.f32.mrf.mxu0  ;;  %v1282_v23 = vadd.f32 %v3754_v1, %v1281_v57  ;;  %v3909_v5 = vpop.f32.mrf.mxu3 }
 0x3dc   : > { %v1202_v50 = vadd.f32 %v3754_v1, %v1201_v24 }
 0x3dd   : > { %v1382_v13 = vmax.f32 %v1282_v23, 0.0 }
 0x3de   : > { %v1350_v29 = vmax.f32 %v1202_v50, 0.0 }
 0x3df   : > { %v1604_v38 = vpop.f32.mrf.mxu1  ;;  %v3912_v21 = vpack.c.bf16 %v1382_v13, %v1381_v44 }
 0x3e0   : > { %v3906_v51 = vpack.c.bf16 %v1350_v29, %v1349_v58 }
 0x3e1   : > { %4334 = vst [vmem:[#allocation31_spill] sm:$0xff] %v3912_v21 }
 0x3e2   : > { %4333 = vst [vmem:[#allocation30_spill] sm:$0xff] %v3906_v51  ;;  %1643 = vmatmul.bf16.gmra.mxu1 %v3906_v51  ;;  %1723 = vmatmul.bf16.gmra.mxu3 %v3912_v21  ;;  %v1284_v60 = vpop.f32.mrf.mxu2 }
 0x3e3   : > { %v1204_v52 = vpop.f32.mrf.mxu0  ;;  %v3915_v24 = vpop.f32.mrf.mxu3  ;;  %v1285_v50 = vadd.f32 %v3754_v1, %v1284_v60 }
 0x3e4   : > { %v1205_v29 = vadd.f32 %v3754_v1, %v1204_v52 }
 0x3e5   : > { %v1383_v13 = vmax.f32 %v1285_v50, 0.0 }
 0x3e6   : > { %v1351_v57 = vmax.f32 %v1205_v29, 0.0 }
 0x3e7   : > { %v1606_v28 = vpop.f32.mrf.mxu1 }
 0x3ea   : > { %v1286_v23 = vpop.f32.mrf.mxu2 }
 0x3eb   : > { %v1206_v58 = vpop.f32.mrf.mxu0  ;;  %v1287_v44 = vadd.f32 %v3754_v1, %v1286_v23  ;;  %v3923_v21 = vpop.f32.mrf.mxu3 }
 0x3ec   : > { %v1207_v40 = vadd.f32 %v3754_v1, %v1206_v58  ;;  %v1605_v1 = vadd.f32 %v3830_v54, %v1604_v38 }
 0x3ed   : > { %v1384_v59 = vmax.f32 %v1287_v44, 0.0  ;;  %v1602_v44 = vadd.f32 %v3830_v54, %v1601_v61 }
 0x3ee   : > { %v1352_v37 = vmax.f32 %v1207_v40, 0.0 }
 0x3ef   : > { %v1609_v51 = vpop.f32.mrf.mxu1  ;;  %v3926_v52 = vpack.c.bf16 %v1384_v59, %v1383_v13 }
 0x3f0   : > { %v3920_v26 = vpack.c.bf16 %v1352_v37, %v1351_v57  ;;  %v1610_v58 = vadd.f32 %v3830_v54, %v1609_v51  ;;  %v1607_v37 = vadd.f32 %v3830_v54, %v1606_v28  ;;  %v1600_v51 = vadd.f32 %v3830_v54, %v3886_v19 }
 0x3f1   : > { %4336 = vst [vmem:[#allocation33_spill] sm:$0xff] %v3926_v52 }
 0x3f2   : > { %4335 = vst [vmem:[#allocation32_spill] sm:$0xff] %v3920_v26  ;;  %1648 = vmatmul.bf16.gmra.mxu1 %v3920_v26  ;;  %1728 = vmatmul.bf16.gmra.mxu3 %v3926_v52  ;;  %2855 = vtanh.f32 %v1610_v58 }
 0x3f3   : > { %v1689_v40 = vpop.f32.mrf.mxu3 }
 0x3f7   : > { %v1611_v60 = vpop.f32.mrf.mxu1 }
 0x3f8   : > { %v1612_v29 = vadd.f32 %v3830_v54, %v1611_v60  ;;  %v2856_v50 = vpop.eup %2855 }
 0x3fa   : > { %2857 = vtanh.f32 %v1612_v29 }
 0x3fb   : > { %2859 = vtanh.f32 %v1607_v37  ;;  %v1691_v59 = vpop.f32.mrf.mxu3 }
 0x3fc   : > { %2861 = vtanh.f32 %v1605_v1 }
 0x3fd   : > { %2863 = vtanh.f32 %v1600_v51  ;;  %v1690_v51 = vadd.f32 %v3830_v54, %v1689_v40  ;;  %v4340_v40 = vpack.c.bf16 %v3790_v18, %v3788_v34 }
 0x3fe   : > { %2865 = vtanh.f32 %v1602_v44 }
 0x3ff   : > { %v1614_v57 = vpop.f32.mrf.mxu1 }
 0x400   : > { %v2858_v23 = vpop.eup %2857  ;;  %v1615_v58 = vadd.f32 %v3830_v54, %v1614_v57 }
 0x401   : > { %v1854_v13 = vpack.c.bf16 %v2858_v23, %v2856_v50  ;;  %v2860_v60 = vpop.eup %2859 }
 0x402   : > { %v2862_v29 = vpop.eup %2861  ;;  %2867 = vtanh.f32 %v1615_v58 }
 0x403   : > { %1905 = vmatpush.bf16.xpose.msra.mxu2 %v1854_v13  ;;  %v3938_v52 = vpop.f32.mrf.mxu3  ;;  %v1853_v37 = vpack.c.bf16 %v2860_v60, %v2862_v29  ;;  %v2864_v1 = vpop.eup %2863  ;;  %v4337_v29 = vpack.c.bf16 %v3888_v36, %v3884_v2  ;;  %v4338_v2 = vpack.c.bf16 %v3859_v12, %v3857_v56 }
 0x404   : > { %v2866_v19 = vpop.eup %2865 }
 0x405   : > { %v1852_v13 = vpack.c.bf16 %v2866_v19, %v2864_v1 }
 0x407   : > { %v1616_v28 = vpop.f32.mrf.mxu1 }
 0x408   : > { %v1617_v38 = vadd.f32 %v3830_v54, %v1616_v28  ;;  %v3940_v50 = vpop.eup %2867 }
 0x40a   : > { %2869 = vtanh.f32 %v1617_v38  ;;  %v3955_v38 = vld [vmem:[#allocation2] sm:$0x3] }
 0x40b   : > { %1906 = vmatpush.bf16.xpose.msra.mxu2 %v1853_v37  ;;  %v3944_v57 = vpop.f32.mrf.mxu3  ;;  %1900 = vmatmul.bf16.vlgmr.msrb.gmra.mxu3 %v3955_v38 }
 0x40c   : > { %1887 = vmatmul.bf16.vlgmr.msrb.gmra.mxu2 %v3955_v38 }
 0x40f   : > { %v1619_v61 = vpop.f32.mrf.mxu1 }
 0x410   : > { %v3942_v23 = vpop.eup %2869  ;;  %v1620_v44 = vadd.f32 %v3830_v54, %v1619_v61 }
 0x412   : > { %2871 = vtanh.f32 %v1620_v44 }
 0x413   : > { %1907 = vmatpush.bf16.xpose.msra.mxu2 %v1852_v13  ;;  %v3950_v28 = vpop.f32.mrf.mxu3  ;;  %v1692_v13 = vadd.f32 %v3830_v54, %v1691_v59  ;;  %v1687_v59 = vadd.f32 %v3830_v54, %v3923_v21  ;;  %v4341_v21 = vpack.c.bf16 %v3761_v4, %v3759_v48 }
 0x417   : > { %v1621_v58 = vpop.f32.mrf.mxu1 }
 0x418   : > { %v1622_v60 = vadd.f32 %v3830_v54, %v1621_v58  ;;  %v3959_v37 = vpop.eup %2871 }
 0x41a   : > { %2873 = vtanh.f32 %v1622_v60 }
 0x41b   : > { %1908 = vmatpush.bf16.xpose.msra.mxu2 %v4337_v29  ;;  %v3963_v61 = vpop.f32.mrf.mxu3  ;;  %v4339_v29 = vpack.c.bf16 %v3822_v0, %v3820_v41  ;;  %v1685_v41 = vadd.f32 %v3830_v54, %v3915_v24 }
 0x41f   : > { %v1624_v1 = vpop.f32.mrf.mxu1 }
 0x420   : > { %v3961_v19 = vpop.eup %2873  ;;  %v1625_v36 = vadd.f32 %v3830_v54, %v1624_v1 }
 0x422   : > { %2875 = vtanh.f32 %v1625_v36 }
 0x423   : > { %1909 = vmatpush.bf16.xpose.msra.mxu2 %v4338_v2 }
 0x425   : > { %v1704_v60 = vpop.f32.mrf.mxu3 }
 0x426   : > { %v1705_v26 = vadd.f32 %v3830_v54, %v1704_v60 }
 0x427   : > { %v1626_v44 = vpop.f32.mrf.mxu1 }
 0x428   : > { %v1627_v58 = vadd.f32 %v3830_v54, %v1626_v44  ;;  %v3978_v12 = vpop.eup %2875 }
 0x42a   : > { %2877 = vtanh.f32 %v1627_v58 }
 0x42b   : > { %1910 = vmatpush.bf16.xpose.msra.mxu2 %v4339_v29  ;;  %2879 = vtanh.f32 %v1690_v51 }
 0x42c   : > { %2881 = vtanh.f32 %v1692_v13 }
 0x42d   : > { %v1706_v2 = vpop.f32.mrf.mxu3  ;;  %2883 = vtanh.f32 %v1705_v26 }
 0x42e   : > { %v1707_v0 = vadd.f32 %v3830_v54, %v1706_v2 }
 0x42f   : > { %v1629_v56 = vpop.f32.mrf.mxu1 }
 0x430   : > { %v3980_v1 = vpop.eup %2877  ;;  %2885 = vtanh.f32 %v1707_v0  ;;  %v1630_v51 = vadd.f32 %v3830_v54, %v1629_v56  ;;  %v1680_v56 = vadd.f32 %v3830_v54, %v3901_v3  ;;  %v1682_v0 = vadd.f32 %v3830_v54, %v3909_v5 }
 0x431   : > { %v1857_v36 = vpack.c.bf16 %v3980_v1, %v3978_v12  ;;  %v2880_v13 = vpop.eup %2879  ;;  %2887 = vtanh.f32 %v1685_v41  ;;  %v1675_v5 = vadd.f32 %v3830_v54, %v3875_v20  ;;  %v4347_v12 = vpack.c.bf16 %v3942_v23, %v3940_v50 }
 0x432   : > { %v2882_v44 = vpop.eup %2881  ;;  %2889 = vtanh.f32 %v1687_v59  ;;  %v1700_v50 = vadd.f32 %v3830_v54, %v3950_v28 }
 0x433   : > { %1911 = vmatpush.bf16.xpose.msra.mxu2 %v4340_v40  ;;  %v3993_v26 = vpop.eup %2883  ;;  %2891 = vtanh.f32 %v1630_v51  ;;  %v1870_v18 = vpack.c.bf16 %v2882_v44, %v2880_v13 }
 0x435   : > { %v1709_v24 = vpop.f32.mrf.mxu3 }
 0x436   : > { %v3996_v29 = vpop.eup %2885  ;;  %v1710_v40 = vadd.f32 %v3830_v54, %v1709_v24 }
 0x437   : > { %v1631_v58 = vpop.f32.mrf.mxu1  ;;  %v2888_v2 = vpop.eup %2887 }
 0x438   : > { %v1632_v60 = vadd.f32 %v3830_v54, %v1631_v58  ;;  %v2890_v41 = vpop.eup %2889  ;;  %v1677_v58 = vadd.f32 %v3830_v54, %v3893_v49 }
 0x439   : > { %v4008_v59 = vpop.eup %2891  ;;  %v1869_v3 = vpack.c.bf16 %v2890_v41, %v2888_v2 }
 0x43a   : > { %2893 = vtanh.f32 %v1632_v60 }
 0x43b   : > { %1912 = vmatpush.bf16.xpose.msra.mxu2 %v4341_v21  ;;  %2895 = vtanh.f32 %v1680_v56 }
 0x43c   : > { %2897 = vtanh.f32 %v1682_v0 }
 0x43d   : > { %v1711_v48 = vpop.f32.mrf.mxu3  ;;  %2899 = vtanh.f32 %v1710_v40 }
 0x43e   : > { %v1712_v44 = vadd.f32 %v3830_v54, %v1711_v48 }
 0x43f   : > { %v1634_v51 = vpop.f32.mrf.mxu1 }
 0x440   : > { %v4010_v13 = vpop.eup %2893  ;;  %2901 = vtanh.f32 %v1712_v44  ;;  %v1635_v60 = vadd.f32 %v3830_v54, %v1634_v51 }
 0x441   : > { %v1858_v4 = vpack.c.bf16 %v4010_v13, %v4008_v59  ;;  %v2896_v24 = vpop.eup %2895  ;;  %2903 = vtanh.f32 %v1675_v5 }
 0x442   : > { %1913 = vmatmul.bf16.vlgmr.msra.gmra.mxu2 %v3955_v38  ;;  %2905 = vtanh.f32 %v1677_v58 }
 0x443   : > { %1931 = vmatpush.bf16.xpose.msrb.mxu2 %v1870_v18  ;;  %v2898_v18 = vpop.eup %2897  ;;  %2907 = vtanh.f32 %v1635_v60 }
 0x444   : > { %v4021_v56 = vpop.eup %2899  ;;  %v1868_v20 = vpack.c.bf16 %v2898_v18, %v2896_v24 }
 0x445   : > { %v1714_v0 = vpop.f32.mrf.mxu3 }
 0x446   : > { %v4024_v41 = vpop.eup %2901  ;;  %v1715_v48 = vadd.f32 %v3830_v54, %v1714_v0  ;;  %v4342_v0 = vpack.c.bf16 %v3877_v25, %v3872_v17 }
 0x447   : > { %v1636_v21 = vpop.f32.mrf.mxu1  ;;  %v2904_v40 = vpop.eup %2903  ;;  %v4348_v23 = vpack.c.bf16 %v4024_v41, %v4021_v56 }
 0x448   : > { %v1637_v2 = vadd.f32 %v3830_v54, %v1636_v21  ;;  %v2906_v51 = vpop.eup %2905 }
 0x449   : > { %v1867_v21 = vpack.c.bf16 %v2906_v51, %v2904_v40  ;;  %v4343_v40 = vpack.c.bf16 %v3846_v16, %v3843_v46 }
 0x44a   : > { %2909 = vtanh.f32 %v1637_v2 }
 0x44b   : > { %1932 = vmatpush.bf16.xpose.msrb.mxu2 %v1869_v3  ;;  %v2908_v3 = vpop.eup %2907  ;;  %2911 = vtanh.f32 %v1715_v48  ;;  %v4344_v48 = vpack.c.bf16 %v3809_v7, %v3806_v45 }
 0x44d   : > { %v1716_v58 = vpop.f32.mrf.mxu3 }
 0x44e   : > { %v1717_v60 = vadd.f32 %v3830_v54, %v1716_v58 }
 0x44f   : > { %v1639_v44 = vpop.f32.mrf.mxu1 }
 0x450   : > { %v2910_v5 = vpop.eup %2909  ;;  %2913 = vtanh.f32 %v1717_v60  ;;  %v1640_v60 = vadd.f32 %v3830_v54, %v1639_v44  ;;  %v1695_v44 = vadd.f32 %v3830_v54, %v3938_v52  ;;  %v4350_v52 = vld [vmem:[#allocation10_spill] sm:$0xff] }
 0x451   : > { %v1859_v34 = vpack.c.bf16 %v2910_v5, %v2908_v3  ;;  %v4030_v18 = vpop.eup %2911  ;;  %v4345_v5 = vpack.c.bf16 %v3777_v8, %v3774_v30 }
 0x453   : > { %1933 = vmatpush.bf16.xpose.msrb.mxu2 %v1868_v20 }
 0x456   : > { %v4032_v2 = vpop.eup %2913 }
 0x457   : > { %v1641_v24 = vpop.f32.mrf.mxu1  ;;  %v1875_v20 = vpack.c.bf16 %v4032_v2, %v4030_v18  ;;  %v1697_v18 = vadd.f32 %v3830_v54, %v3944_v57 }
 0x45b   : > { %1934 = vmatpush.bf16.xpose.msrb.mxu2 %v1867_v21  ;;  %v1719_v21 = vpop.f32.mrf.mxu3 }
 0x45f   : > { %v1644_v49 = vpop.f32.mrf.mxu1 }
 0x460   : > { %v1645_v30 = vadd.f32 %v3830_v54, %v1644_v49 }
 0x463   : > { %1935 = vmatpush.bf16.xpose.msrb.mxu2 %v4342_v0  ;;  %v1721_v46 = vpop.f32.mrf.mxu3 }
 0x464   : > { %v1722_v1 = vadd.f32 %v3830_v54, %v1721_v46  ;;  %v4357_v46 = vld [vmem:[#allocation26_spill] sm:$0xff] }
 0x467   : > { %v1646_v51 = vpop.f32.mrf.mxu1 }
 0x468   : > { %v1647_v45 = vadd.f32 %v3830_v54, %v1646_v51  ;;  %v4349_v51 = vpack.c.bf16 %v3996_v29, %v3993_v26  ;;  %v4351_v26 = vld [vmem:[#allocation13_spill] sm:$0xff]  ;;  %v1963_v29 = vld [vmem:[%s420_s13] sm:$0x3f] }
 0x46b   : > { %1936 = vmatpush.bf16.xpose.msrb.mxu2 %v4343_v40  ;;  %v1724_v49 = vpop.f32.mrf.mxu3 }
 0x46f   : > { %v1649_v3 = vpop.f32.mrf.mxu1 }
 0x470   : > { %v1650_v58 = vadd.f32 %v3830_v54, %v1649_v3  ;;  %v1966_v3 = vperm.slane %v1963_v29, 1 }
 0x472   : > { %2915 = vtanh.f32 %v1650_v58 }
 0x473   : > { %1937 = vmatpush.bf16.xpose.msrb.mxu2 %v4344_v48 }
 0x477   : > { %v1651_v17 = vpop.f32.mrf.mxu1 }
 0x478   : > { %v1652_v25 = vadd.f32 %v3830_v54, %v1651_v17  ;;  %v2916_v8 = vpop.eup %2915 }
 0x47a   : > { %2917 = vtanh.f32 %v1652_v25  ;;  %v4354_v25 = vld [vmem:[#allocation32_spill] sm:$0xff] }
 0x47b   : > { %1938 = vmatpush.bf16.xpose.msrb.mxu2 %v4345_v5  ;;  %2919 = vtanh.f32 %v1647_v45 }
 0x47c   : > { %2921 = vtanh.f32 %v1645_v30  ;;  %v4355_v30 = vld [vmem:[#allocation30_spill] sm:$0xff] }
 0x480   : > { %v2918_v7 = vpop.eup %2917 }
 0x481   : > { %v2920_v16 = vpop.eup %2919 }
 0x482   : > { %1939 = vmatmul.bf16.vlgmr.msrb.gmra.mxu2 %v3955_v38  ;;  %v2922_v0 = vpop.eup %2921 }
 0x483   : > { %2074 = vmatpush.bf16.msra.mxu2 %v3462_v55  ;;  %v1862_v55 = vpack.c.bf16 %v2918_v7, %v2916_v8 }
 0x485   : > { %1918 = vmatpush.bf16.xpose.msra.mxu3 %v1862_v55  ;;  %v4356_v55 = vld [vmem:[#allocation28_spill] sm:$0xff] }
 0x487   : > { %2075 = vmatpush.bf16.msra.mxu2 %v3456_v47  ;;  %v1642_v47 = vadd.f32 %v3830_v54, %v1641_v24 }
 0x489   : > { %2923 = vtanh.f32 %v1642_v47 }
 0x48a   : > { %2925 = vtanh.f32 %v1640_v60  ;;  %v4359_v60 = vld [vmem:[#allocation22_spill] sm:$0xff] }
 0x48b   : > { %2076 = vmatpush.bf16.msra.mxu2 %v3450_v22  ;;  %v1861_v22 = vpack.c.bf16 %v2920_v16, %v2922_v0  ;;  %v4358_v16 = vld [vmem:[#allocation24_spill] sm:$0xff] }
 0x48d   : > { %1919 = vmatpush.bf16.xpose.msra.mxu3 %v1861_v22  ;;  %v4360_v22 = vld [vmem:[#allocation20_spill] sm:$0xff] }
 0x48f   : > { %2077 = vmatpush.bf16.msra.mxu2 %v3444_v14  ;;  %v2924_v14 = vpop.eup %2923 }
 0x490   : > { %v2926_v40 = vpop.eup %2925 }
 0x491   : > { %v1860_v24 = vpack.c.bf16 %v2924_v14, %v2926_v40  ;;  %v1967_v40 = vperm.slane %v1963_v29, 2 }
 0x493   : > { %2078 = vmatpush.bf16.msra.mxu2 %v3438_v39  ;;  %v1726_v39 = vpop.f32.mrf.mxu3 }
 0x495   : > { %1920 = vmatpush.bf16.xpose.msra.mxu3 %v1860_v24  ;;  %v1968_v24 = vperm.slane %v1963_v29, 3 }
 0x497   : > { %2079 = vmatpush.bf16.msra.mxu2 %v3432_v31 }
 0x49b   : > { %2080 = vmatpush.bf16.msra.mxu2 %v3426_v9  ;;  %v1729_v31 = vpop.f32.mrf.mxu3 }
 0x49c   : > { %v1730_v9 = vadd.f32 %v3830_v54, %v1729_v31 }
 0x49d   : > { %1921 = vmatpush.bf16.xpose.msra.mxu3 %v1859_v34 }
 0x49e   : > { %2927 = vtanh.f32 %v1730_v9 }
 0x49f   : > { %2081 = vmatpush.bf16.msra.mxu2 %v3420_v63 }
 0x4a3   : > { %2100 = vmatpush.bf16.msrb.mxu2 %v3724_v42  ;;  %v1731_v63 = vpop.f32.mrf.mxu3 }
 0x4a5   : > { %1922 = vmatpush.bf16.xpose.msra.mxu3 %v1858_v4  ;;  %v1702_v4 = vadd.f32 %v3830_v54, %v3963_v61 }
 0x4a7   : > { %2101 = vmatpush.bf16.msrb.mxu2 %v3712_v6 }
 0x4ab   : > { %2102 = vmatpush.bf16.msrb.mxu2 %v3696_v11  ;;  %v2928_v11 = vpop.eup %2927 }
 0x4ad   : > { %1923 = vmatpush.bf16.xpose.msra.mxu3 %v1857_v36 }
 0x4af   : > { %2103 = vmatpush.bf16.msrb.mxu2 %v3674_v35  ;;  %v1732_v35 = vadd.f32 %v3830_v54, %v1731_v63 }
 0x4b1   : > { %2929 = vtanh.f32 %v1732_v35 }
 0x4b3   : > { %2104 = vmatpush.bf16.msrb.mxu2 %v3648_v10  ;;  %v4346_v10 = vpack.c.bf16 %v3961_v19, %v3959_v37 }
 0x4b5   : > { %1924 = vmatpush.bf16.xpose.msra.mxu3 %v4346_v10 }
 0x4b7   : > { %2105 = vmatpush.bf16.msrb.mxu2 %v3622_v53  ;;  %v1725_v53 = vadd.f32 %v3830_v54, %v1724_v49  ;;  %v2930_v6 = vpop.eup %2929  ;;  %v4361_v49 = vld [vmem:[#allocation18_spill] sm:$0xff] }
 0x4b8   : > { %v1878_v42 = vpack.c.bf16 %v2930_v6, %v2928_v11  ;;  %v1969_v11 = vperm.slane %v1963_v29, 4 }
 0x4b9   : > { %2931 = vtanh.f32 %v1725_v53 }
 0x4bb   : > { %2106 = vmatpush.bf16.msrb.mxu2 %v3599_v27  ;;  %v1727_v27 = vadd.f32 %v3830_v54, %v1726_v39 }
 0x4bd   : > { %2933 = vtanh.f32 %v1727_v27  ;;  %1925 = vmatpush.bf16.xpose.msra.mxu3 %v4347_v12 }
 0x4bf   : > { %2107 = vmatpush.bf16.msrb.mxu2 %v3578_v15  ;;  %v1720_v15 = vadd.f32 %v3830_v54, %v1719_v21  ;;  %v2932_v37 = vpop.eup %2931  ;;  %v1888_v54 = vpop.f32.mrf.mxu2 }
 0x4c1   : > { %2935 = vtanh.f32 %v1720_v15 }
 0x4c2   : > { %2937 = vtanh.f32 %v1722_v1 }
 0x4c3   : > { %v2934_v19 = vpop.eup %2933  ;;  %2939 = vtanh.f32 %v1700_v50 }
 0x4c4   : > { %v1877_v36 = vpack.c.bf16 %v2934_v19, %v2932_v37  ;;  %1926 = vmatmul.bf16.vlgmr.msra.gmra.mxu3 %v3955_v38  ;;  %2941 = vtanh.f32 %v1702_v4 }
 0x4c5   : > { %1944 = vmatpush.bf16.xpose.msrb.mxu3 %v1878_v42  ;;  %2943 = vtanh.f32 %v1695_v44  ;;  %v1970_v42 = vperm.slane %v1963_v29, 5 }
 0x4c6   : > { %2945 = vtanh.f32 %v1697_v18 }
 0x4c7   : > { %v2936_v34 = vpop.eup %2935  ;;  %v1890_v57 = vpop.f32.mrf.mxu2 }
 0x4c8   : > { %v2938_v59 = vpop.eup %2937 }
 0x4c9   : > { %v1876_v13 = vpack.c.bf16 %v2938_v59, %v2936_v34  ;;  %v2940_v28 = vpop.eup %2939 }
 0x4ca   : > { %v2942_v2 = vpop.eup %2941 }
 0x4cb   : > { %v1872_v56 = vpack.c.bf16 %v2942_v2, %v2940_v28  ;;  %v2944_v61 = vpop.eup %2943 }
 0x4cc   : > { %v2946_v41 = vpop.eup %2945 }
 0x4cd   : > { %1945 = vmatpush.bf16.xpose.msrb.mxu3 %v1877_v36 }
 0x4cf   : > { %v1914_v48 = vpop.f32.mrf.mxu2 }
 0x4d0   : > { %v1959_v14 = vmul.f32 0.088388346, %v1914_v48 }
 0x4d2   : > { %v1979_v63 = vadd.f32 %v1967_v40, %v1959_v14 }
 0x4d4   : > { %v2005_v59 = vsel %vm1992_vm1, %v1979_v63, -inf }
 0x4d5   : > { %1946 = vmatpush.bf16.xpose.msrb.mxu3 %v1876_v13 }
 0x4d7   : > { %v1916_v8 = vpop.f32.mrf.mxu2 }
 0x4dd   : > { %1947 = vmatpush.bf16.xpose.msrb.mxu3 %v1875_v20  ;;  %v1871_v20 = vpack.c.bf16 %v2946_v41, %v2944_v61  ;;  %v2002_v61 = vld [vmem:[#allocation3] sm:$0xf] }
 0x4e5   : > { %1948 = vmatpush.bf16.xpose.msrb.mxu3 %v4348_v23 }
 0x4ed   : > { %1949 = vmatpush.bf16.xpose.msrb.mxu3 %v4349_v51 }
 0x4f5   : > { %1950 = vmatpush.bf16.xpose.msrb.mxu3 %v1872_v56  ;;  %v2977_v56 = vmov 0  }
 0x4f6   : > { %2751 = vset.pattern.permute.xlu0 %v2977_v56  ;;  %2752 = vset.pattern.permute.xlu1 %v2977_v56 }
 0x4fd   : > { %1951 = vmatpush.bf16.xpose.msrb.mxu3 %v1871_v20 }
 0x504   : > { %1952 = vmatmul.bf16.vlgmr.msrb.gmra.mxu3 %v3955_v38  ;;  %v1965_v38 = vperm.slane %v1963_v29, 0 }
 0x505   : > { %2087 = vmatpush.bf16.msra.mxu3 %v3565_v33  ;;  %v4352_v33 = vld [vmem:[#allocation12_spill] sm:$0xff]  ;;  %v1940_v47 = vpop.f32.mrf.mxu2 }
 0x506   : > { %v1961_v27 = vmul.f32 0.088388346, %v1940_v47 }
 0x508   : > { %v1981_v6 = vadd.f32 %v1969_v11, %v1961_v27  ;;  %v4366_v27 = vld [vmem:[#allocation15_spill] sm:$0xff]  ;;  %v4367_v11 = vld [vmem:[#allocation29_spill] sm:$0xff] }
 0x509   : > { %2088 = vmatpush.bf16.msra.mxu3 %v3558_v62  ;;  %v1957_v62 = vmul.f32 0.088388346, %v1888_v54 }
 0x50a   : > { %v2007_v19 = vsel %vm1992_vm1, %v1981_v6, -inf }
 0x50b   : > { %v4121_v58 = vadd.f32 %v1965_v38, %v1957_v62 }
 0x50d   : > { %2089 = vmatpush.bf16.msra.mxu3 %v3549_v43  ;;  %v1901_v43 = vpop.f32.mrf.mxu3  ;;  %v1942_v0 = vpop.f32.mrf.mxu2  ;;  %v2003_v37 = vsel %vm1992_vm1, %v4121_v58, -inf }
 0x50e   : > { %v1958_v5 = vmul.f32 0.088388346, %v1901_v43  ;;  %v2008_v23 = vmax.f32 %v2003_v37, %v2007_v19  ;;  %v4371_v37 = vld [vmem:[#allocation25_spill] sm:$0xff] }
 0x50f   : > { %v4372_v19 = vld [vmem:[#allocation9_spill] sm:$0xff] }
 0x510   : > { %v4123_v17 = vadd.f32 %v1966_v3, %v1958_v5 }
 0x511   : > { %2090 = vmatpush.bf16.msra.mxu3 %v3532_v32  ;;  %v4353_v32 = vld [vmem:[#allocation14_spill] sm:$0xff] }
 0x512   : > { %v1989_v21 = vrot.slane %v4123_v17, 4  ;;  %v2004_v36 = vsel %vm1992_vm1, %v4123_v17, -inf }
 0x514   : > { %v1993_v45 = vsel %vm1992_vm1, %v4121_v58, %v1989_v21 }
 0x515   : > { %2091 = vmatpush.bf16.msra.mxu3 %v4350_v52  ;;  %1999 = vst [vmem:[%s3166_s23] sm:$0xff] %v1993_v45  ;;  %v1903_v7 = vpop.f32.mrf.mxu3 }
 0x519   : > { %2092 = vmatpush.bf16.msra.mxu3 %v4351_v26 }
 0x51d   : > { %2093 = vmatpush.bf16.msra.mxu3 %v4352_v33 }
 0x521   : > { %2094 = vmatpush.bf16.msra.mxu3 %v4353_v32 }
 0x525   : > { %2113 = vmatpush.bf16.msrb.mxu3 %v4354_v25 }
 0x529   : > { %2114 = vmatpush.bf16.msrb.mxu3 %v4355_v30 }
 0x52d   : > { %2115 = vmatpush.bf16.msrb.mxu3 %v4356_v55 }
 0x531   : > { %2116 = vmatpush.bf16.msrb.mxu3 %v4357_v46 }
 0x535   : > { %2117 = vmatpush.bf16.msrb.mxu3 %v4358_v16 }
 0x539   : > { %2118 = vmatpush.bf16.msrb.mxu3 %v4359_v60  ;;  %v4362_v60 = vld [vmem:[#allocation17_spill] sm:$0xff] }
 0x53d   : > { %2119 = vmatpush.bf16.msrb.mxu3 %v4360_v22 }
 0x541   : > { %2120 = vmatpush.bf16.msrb.mxu3 %v4361_v49  ;;  %v4363_v49 = vld [vmem:[#allocation33_spill] sm:$0xff] }
 0x547   : > { %v1927_v39 = vpop.f32.mrf.mxu3 }
 0x548   : > { %v1960_v31 = vmul.f32 0.088388346, %v1927_v39 }
 0x54a   : > { %v1980_v9 = vadd.f32 %v1968_v24, %v1960_v31  ;;  %v4364_v31 = vld [vmem:[#allocation16_spill] sm:$0xff] }
 0x54c   : > { %v1990_v35 = vrot.slane %v1980_v9, 4  ;;  %v2006_v13 = vsel %vm1992_vm1, %v1980_v9, -inf }
 0x54d   : > { %v2012_v28 = vmax.f32 %v2005_v59, %v2006_v13  ;;  %v4375_v59 = vld [vmem:[#allocation21_spill] sm:$0xff]  ;;  %v4376_v13 = vld [vmem:[#allocation11_spill] sm:$0xff] }
 0x54e   : > { %v1994_v10 = vsel %vm1992_vm1, %v1979_v63, %v1990_v35 }
 0x54f   : > { %2000 = vst [vmem:[%s3166_s23 + $0x8] sm:$0xff] %v1994_v10  ;;  %v1929_v53 = vpop.f32.mrf.mxu3 }
 0x587   : > { %v1953_v12 = vpop.f32.mrf.mxu3 }
 0x588   : > { %v1962_v15 = vmul.f32 0.088388346, %v1953_v12 }
 0x58a   : > { %v1982_v1 = vadd.f32 %v1970_v42, %v1962_v15  ;;  %v4369_v42 = vld [vmem:[#allocation27_spill] sm:$0xff] }
 0x58c   : > { %v1991_v34 = vrot.slane %v1982_v1, 4  ;;  %v2009_v50 = vsel %vm1992_vm1, %v1982_v1, -inf }
 0x58d   : > { %v2010_v4 = vmax.f32 %v2004_v36, %v2009_v50  ;;  %v4373_v36 = vld [vmem:[#allocation23_spill] sm:$0xff] }
 0x58e   : > { %v1995_v44 = vsel %vm1992_vm1, %v1981_v6, %v1991_v34  ;;  %v4374_v34 = vld [vmem:[#allocation8_spill] sm:$0xff]  ;;  %v4377_v50 = vld [vmem:[#allocation19_spill] sm:$0xff] }
 0x58f   : > { %2001 = vst [vmem:[%s3166_s23 + $0x10] sm:$0xff] %v1995_v44  ;;  %v1955_v51 = vpop.f32.mrf.mxu3  ;;  %v2011_v18 = vmax.f32 %v2008_v23, %v2010_v4 }
 0x590   : > { %v2043_v51 = vld [vmem:[#allocation4] sm:$0xf] }
 0x591   : > { %v2013_v2 = vmax.f32 %v2011_v18, %v2012_v28 }
 0x593   : > { %2014 = vmax.xlane.f32.xlu0 %v2013_v2 }
 0x606   : > { %v2015_v41 = vpop.xlane.xlu0 %2014 }
 0x607   : > { %v2016_v20 = vmax.f32 %v2002_v61, %v2015_v41 }
 0x609   : > { %v2017_v54 = vsub.f32 %v2002_v61, %v2016_v20  ;;  %2154 = vst.msk [vmem:[#allocation3] sm:$0xf] %vm2059_vm2, %v2016_v20  ;;  %2022 = vperm.xlu0 %2751, %v2016_v20  }
 0x60b   : > { %v2018_v52 = vmul.f32 1.442695, %v2017_v54 }
 0x60d   : > { %2947 = vpow2.f32 %v2018_v52 }
 0x613   : > { %v4150_v57 = vpop.eup %2947 }
 0x614   : > { %2064 = vperm.xlu1 %2752, %v4150_v57   ;;  %v2044_v18 = vmul.f32 %v4150_v57, %v2043_v51 }
 0x67b   : > { %v2023_v26 = vpop.permute.xlu0 %2022 }
 0x67c   : > { %v2025_v29 = vsub.f32 %v4121_v58, %v2023_v26  ;;  %v2026_v33 = vsub.f32 %v4123_v17, %v2023_v26  ;;  %v2027_v62 = vsub.f32 %v1979_v63, %v2023_v26  ;;  %v2028_v38 = vsub.f32 %v1980_v9, %v2023_v26  ;;  %v4365_v9 = vld [vmem:[#allocation31_spill] sm:$0xff] }
 0x67d   : > { %v2029_v48 = vsub.f32 %v1981_v6, %v2023_v26  ;;  %v2030_v32 = vsub.f32 %v1982_v1, %v2023_v26  ;;  %v4368_v6 = vld [vmem:[#allocation7_spill] sm:$0xff]  ;;  %v4370_v1 = vld [vmem:[#allocation6_spill] sm:$0xff] }
 0x67e   : > { %v2031_v43 = vmul.f32 1.442695, %v2025_v29  ;;  %v2033_v3 = vmul.f32 1.442695, %v2026_v33  ;;  %v2035_v5 = vmul.f32 1.442695, %v2027_v62 }
 0x67f   : > { %v2037_v25 = vmul.f32 1.442695, %v2028_v38  ;;  %v2039_v21 = vmul.f32 1.442695, %v2029_v48  ;;  %v2041_v45 = vmul.f32 1.442695, %v2030_v32 }
 0x680   : > { %2949 = vpow2.f32 %v2031_v43  ;;  %v2061_v48 = vld [vmem:[#allocation5] sm:$0xf] }
 0x681   : > { %2951 = vpow2.f32 %v2033_v3 }
 0x682   : > { %2953 = vpow2.f32 %v2035_v5 }
 0x683   : > { %2955 = vpow2.f32 %v2037_v25 }
 0x684   : > { %2957 = vpow2.f32 %v2039_v21 }
 0x685   : > { %2959 = vpow2.f32 %v2041_v45 }
 0x686   : > { %v2950_v30 = vpop.eup %2949  ;;  %v2065_v44 = vpop.permute.xlu1 %2064 }
 0x687   : > { %v2952_v8 = vpop.eup %2951  ;;  %v2068_v58 = vpack.c.bf16 %v2950_v30, %v2950_v30  ;;  %v2045_v17 = vsel %vm1992_vm1, %v2950_v30, 0.0  ;;  %v2067_v57 = vmul.f32 %v2065_v44, %v2061_v48 }
 0x688   : > { %v2954_v7 = vpop.eup %2953  ;;  %v2069_v55 = vpack.c.bf16 %v2952_v8, %v2952_v8  ;;  %v2046_v46 = vsel %vm1992_vm1, %v2952_v8, 0.0 }
 0x689   : > { %v2956_v47 = vpop.eup %2955  ;;  %2082 = vmatmul.bf16.vlgmr.msra.gmra.mxu2 %v2068_v58  ;;  %v2047_v16 = vadd.f32 %v2046_v46, %v2045_v17  ;;  %v2048_v0 = vsel %vm1992_vm1, %v2954_v7, 0.0  ;;  %v2070_v12 = vpack.c.bf16 %v2954_v7, %v2954_v7 }
 0x68a   : > { %2095 = vmatmul.bf16.vlgmr.msra.gmra.mxu3 %v2069_v55  ;;  %2126 = vmatpush.bf16.msra.mxu2 %v4362_v60  ;;  %v2958_v22 = vpop.eup %2957  ;;  %v2050_v40 = vsel %vm1992_vm1, %v2956_v47, 0.0  ;;  %v2071_v15 = vpack.c.bf16 %v2956_v47, %v2956_v47 }
 0x68b   : > { %2139 = vmatpush.bf16.msra.mxu3 %v4363_v49  ;;  %v2049_v14 = vadd.f32 %v2048_v0, %v2047_v16  ;;  %v2960_v24 = vpop.eup %2959  ;;  %v2052_v63 = vsel %vm1992_vm1, %v2958_v22, 0.0  ;;  %v2072_v23 = vpack.c.bf16 %v2958_v22, %v2958_v22 }
 0x68c   : > { %v2054_v10 = vsel %vm1992_vm1, %v2960_v24, 0.0  ;;  %v2073_v4 = vpack.c.bf16 %v2960_v24, %v2960_v24 }
 0x68d   : > { %v2051_v39 = vadd.f32 %v2050_v40, %v2049_v14 }
 0x68e   : > { %2127 = vmatpush.bf16.msra.mxu2 %v4364_v31 }
 0x68f   : > { %2140 = vmatpush.bf16.msra.mxu3 %v4365_v9  ;;  %v2053_v35 = vadd.f32 %v2052_v63, %v2051_v39 }
 0x691   : > { %v2055_v53 = vadd.f32 %v2054_v10, %v2053_v35 }
 0x692   : > { %2128 = vmatpush.bf16.msra.mxu2 %v4366_v27 }
 0x693   : > { %2141 = vmatpush.bf16.msra.mxu3 %v4367_v11  ;;  %2056 = vadd.xlane.f32.xlu1 %v2055_v53 }
 0x696   : > { %2129 = vmatpush.bf16.msra.mxu2 %v4368_v6 }
 0x697   : > { %2142 = vmatpush.bf16.msra.mxu3 %v4369_v42 }
 0x699   : > { %2108 = vmatmul.bf16.vlgmr.msrb.gmra.mxu2 %v2070_v12 }
 0x69a   : > { %2121 = vmatmul.bf16.vlgmr.msrb.gmra.mxu3 %v2071_v15  ;;  %2130 = vmatpush.bf16.msra.mxu2 %v4370_v1 }
 0x69b   : > { %2143 = vmatpush.bf16.msra.mxu3 %v4371_v37 }
 0x69e   : > { %2131 = vmatpush.bf16.msra.mxu2 %v4372_v19 }
 0x69f   : > { %2144 = vmatpush.bf16.msra.mxu3 %v4373_v36 }
 0x6a2   : > { %2132 = vmatpush.bf16.msra.mxu2 %v4374_v34 }
 0x6a3   : > { %2145 = vmatpush.bf16.msra.mxu3 %v4375_v59 }
 0x6a6   : > { %2133 = vmatpush.bf16.msra.mxu2 %v4376_v13 }
 0x6a7   : > { %2146 = vmatpush.bf16.msra.mxu3 %v4377_v50 }
 0x6a9   : > { %2134 = vmatmul.bf16.vlgmr.msra.gmra.mxu2 %v2072_v23 }
 0x6aa   : > { %2147 = vmatmul.bf16.vlgmr.msra.gmra.mxu3 %v2073_v4 }
 0x706   : > { %v2057_v28 = vpop.xlane.xlu1 %2056 }
 0x707   : > { %v2058_v2 = vadd.f32 %v2057_v28, %v2044_v18 }
 0x709   : > { %2060 = vst.msk [vmem:[#allocation4] sm:$0xf] %vm2059_vm2, %v2058_v2 }
 0x70c   : > { %v2083_v56 = vpop.f32.mrf.mxu2 }
 0x70d   : > { %v2096_v61 = vpop.f32.mrf.mxu3 }
 0x70e   : > { %v2097_v29 = vadd.f32 %v2096_v61, %v2083_v56 }
 0x714   : > { %v2085_v41 = vpop.f32.mrf.mxu2 }
 0x715   : > { %v2098_v20 = vpop.f32.mrf.mxu3 }
 0x71c   : > { %v2109_v54 = vpop.f32.mrf.mxu2 }
 0x71d   : > { %v2122_v52 = vpop.f32.mrf.mxu3  ;;  %v2110_v62 = vadd.f32 %v2109_v54, %v2097_v29 }
 0x71f   : > { %v2123_v38 = vadd.f32 %v2122_v52, %v2110_v62 }
 0x724   : > { %v2111_v26 = vpop.f32.mrf.mxu2 }
 0x725   : > { %v2124_v33 = vpop.f32.mrf.mxu3 }
 0x72c   : > { %v2135_v43 = vpop.f32.mrf.mxu2 }
 0x72d   : > { %v2136_v3 = vadd.f32 %v2135_v43, %v2123_v38  ;;  %v2148_v5 = vpop.f32.mrf.mxu3 }
 0x72f   : > { %v2149_v32 = vadd.f32 %v2148_v5, %v2136_v3 }
 0x731   : > { %v2152_v25 = vadd.f32 %v2149_v32, %v2067_v57  ;;  %2158 = sbr.rel (%p2636_p6) target bundleno = 2111 (0x83f), region = 64 }
 0x733   : > { %2153 = vst [vmem:[#allocation5] sm:$0xf] %v2152_v25 }
 0x734   : > { %v2137_v21 = vpop.f32.mrf.mxu2 }
 0x735   : > { %v2150_v45 = vpop.f32.mrf.mxu3 }
 0x736   : > { %v2159_v30 = vld [vmem:[#allocation4] sm:$0xf]  ;;  %v2196_v8 = vld [vmem:[%s4252_s7 + $0x78] sm:$0xff]  ;;  %v2195_v58 = vld [vmem:[%s4252_s7 + $0x70] sm:$0xff]  ;;  %v2978_v17 = vmov 0  }
 0x737   : > { %2963 = vset.pattern.permute.xlu0 %v2978_v17  ;;  %2224 = vst.msk [vmem:[%s4257_s12] sm:$0xf] %vm2059_vm2, %v2159_v30  ;;  %2201 = vmatpush.msra.mxu0 %v2196_v8  ;;  %v2194_v7 = vld [vmem:[%s4252_s7 + $0x68] sm:$0xff]  ;;  %v2193_v55 = vld [vmem:[%s4252_s7 + $0x60] sm:$0xff]  ;;  %v2192_v46 = vld [vmem:[%s4252_s7 + $0x58] sm:$0xff] }
 0x738   : > { %2163 = vperm.xlu0 %2963, %v2159_v30   ;;  %v2191_v47 = vld [vmem:[%s4252_s7 + $0x50] sm:$0xff]  ;;  %v2190_v16 = vld [vmem:[%s4252_s7 + $0x48] sm:$0xff]  ;;  %v2189_v60 = vld [vmem:[%s4252_s7 + $0x40] sm:$0xff] }
 0x739   : > { %2202 = vmatpush.msra.mxu0 %v2195_v58  ;;  %v2188_v0 = vld [vmem:[%s4252_s7 + $0x38] sm:$0xff]  ;;  %v2187_v22 = vld [vmem:[%s4252_s7 + $0x30] sm:$0xff]  ;;  %v2186_v49 = vld [vmem:[%s4252_s7 + $0x28] sm:$0xff] }
 0x73a   : > { %v2185_v14 = vld [vmem:[%s4252_s7 + $0x20] sm:$0xff]  ;;  %v2184_v40 = vld [vmem:[%s4252_s7 + $0x18] sm:$0xff]  ;;  %v2183_v24 = vld [vmem:[%s4252_s7 + $0x10] sm:$0xff] }
 0x73b   : > { %2203 = vmatpush.msra.mxu0 %v2194_v7  ;;  %v2182_v39 = vld [vmem:[%s4252_s7 + $0x8] sm:$0xff]  ;;  %v2181_v31 = vld [vmem:[%s4252_s7] sm:$0xff] }
 0x73c   : > { %v2160_v12 = vld [vmem:[#allocation5] sm:$0xf]  ;;  %v2222_v19 = vld [vmem:[#allocation3] sm:$0xf]  ;;  %v2964_v36 = vld [vmem:[%s4253_s8] ss:$0 sm:$0xff] }
 0x73d   : > { %2204 = vmatpush.msra.mxu0 %v2193_v55  ;;  %2223 = vst.msk [vmem:[%s4256_s11] sm:$0xf] %vm2059_vm2, %v2222_v19 }
 0x73f   : > { %2205 = vmatpush.msra.mxu0 %v2192_v46 }
 0x741   : > { %2206 = vmatpush.msra.mxu0 %v2191_v47 }
 0x743   : > { %2207 = vmatpush.msra.mxu0 %v2190_v16 }
 0x745   : > { %2208 = vmatpush.msra.mxu0 %v2189_v60 }
 0x747   : > { %2209 = vmatpush.msra.mxu0 %v2188_v0 }
 0x749   : > { %2210 = vmatpush.msra.mxu0 %v2187_v22 }
 0x74b   : > { %2211 = vmatpush.msra.mxu0 %v2186_v49 }
 0x74d   : > { %2212 = vmatpush.msra.mxu0 %v2185_v14 }
 0x74f   : > { %2213 = vmatpush.msra.mxu0 %v2184_v40 }
 0x751   : > { %2214 = vmatpush.msra.mxu0 %v2183_v24 }
 0x753   : > { %2215 = vmatpush.msra.mxu0 %v2182_v39 }
 0x755   : > { %2216 = vmatpush.msra.mxu0 %v2181_v31 }
 0x7aa   : > { %v2164_v63 = vpop.permute.xlu0 %2163 }
 0x7ab   : > { %2965 = vrcp.f32 %v2164_v63  ;;  %v2177_v53 = vand.u32 2147483648, %v2164_v63  ;;  %v2175_v11 = vand.u32 2147483647, %v2164_v63  ;;  %vm2171_vm4 = vweird.f32 %v2164_v63 }
 0x7ad   : > { %v2178_v42 = vor.u32 1.1754944e-38, %v2177_v53  ;;  %vm2176_vm6 = vcmp.eq.f32.partialorder %v2175_v11, 8.507059e+37 }
 0x7b1   : > { %v2966_v9 = vpop.eup %2965 }
 0x7b2   : > { %v2167_v35 = vmul.f32 %v2966_v9, %v2164_v63  ;;  %vm2172_vm3 = vweird.f32 %v2966_v9 }
 0x7b3   : > { %vm2173_vm5 = vmor %vm2171_vm4, %vm2172_vm3 }
 0x7b4   : > { %v2168_v10 = vsub.f32 1.0, %v2167_v35 }
 0x7b6   : > { %v2169_v27 = vmul.f32 %v2966_v9, %v2168_v10 }
 0x7b8   : > { %v2170_v6 = vadd.f32 %v2966_v9, %v2169_v27 }
 0x7ba   : > { %v2174_v15 = vsel %vm2173_vm5, %v2966_v9, %v2170_v6 }
 0x7bb   : > { %v2179_v1 = vsel %vm2176_vm6, %v2178_v42, %v2174_v15 }
 0x7bc   : > { %v2180_v37 = vmul.f32 %v2179_v1, %v2160_v12 }
 0x7be   : > { %2217 = vmatmul.f32.vlgmr.msra.gmra.mxu0 %v2180_v37 }
 0x83b   : > { %v2218_v34 = vpop.f32.mrf.mxu0 }
 0x83c   : > { %v2219_v59 = vadd.f32 %v2964_v36, %v2218_v34 }
 0x83e   : > { %2221 = vst [vmem:[%s4255_s10] sm:$0xf] %v2219_v59 }
 0x83f PF: > { %s23_s21 = sadd.s32 1, %s2973_s21  }
 0x840   : > { %p20_p7 = scmp.ge.s32.totalorder %s23_s21, 4  }
 0x842   :  { %22 = sbr.rel (!%p20_p7) target bundleno = 1 (0x1), region = 121 }

</bundles_post_ra>
